<compile_context>
chip_gen: v5e
topology: v5e:2x2
jax: 0.10.0
libtpu: 0.0.40
codegen_flags: <defaults>
</compile_context>

<pallas_src>
import numpy as np
import jax
import jax.numpy as jnp
from jax.experimental import pallas as pl
from jax.experimental.pallas import tpu as pltpu


# ------------------------- host-side packing helpers -------------------------

def space_to_depth2(x):
    """(B,H,W,C) -> (B,H/2,W/2,4C); last-dim order (dy, dx, c) — k=2,s=2 patches."""
    B, H, W, C = x.shape
    x = x.reshape(B, H // 2, 2, W // 2, 2, C)
    x = jnp.transpose(x, (0, 1, 3, 2, 4, 5))
    return x.reshape(B, H // 2, W // 2, 4 * C)


def oihw_to_mat(w):
    """PyTorch (O,I,kh,kw) conv weight -> GEMM weight (kh*kw*I, O), order (dy,dx,c)."""
    O, I, kh, kw = w.shape
    return jnp.transpose(w, (2, 3, 1, 0)).reshape(kh * kw * I, O)


def conv2_edge_mask(H1, W1, reps):
    """(9, reps*H1*W1, 1) 0/1 mask: tap d=(ky,kx) of a 3x3/pad=1 conv is valid at
    flattened position (y,x).  Zeroing invalid rows also kills cross-image reads
    when several images are folded into one row block."""
    M1 = H1 * W1
    m = np.zeros((9, M1, 1), np.float32)
    for ky in range(3):
        for kx in range(3):
            d = ky * 3 + kx
            for y in range(H1):
                if not (0 <= y + ky - 1 < H1):
                    continue
                for x in range(W1):
                    if not (0 <= x + kx - 1 < W1):
                        continue
                    m[d, y * W1 + x, 0] = 1.0
    return np.tile(m, (1, reps, 1))


# ------------------------- fused Pallas kernel -------------------------

def _make_kernel(Bt, H1, W1):
    M1 = H1 * W1
    H3, W3 = H1 // 2, W1 // 2
    R1 = Bt * M1          # conv1/conv2 GEMM rows (batch folded into rows)
    RG = Bt * H3          # rows per x-output column group after stride-2 gather

    def roll_rows(v, k):
        # result[r] = v[(r + k) % R]; k is a static Python int (two static slices).
        k = k % v.shape[0]
        if k == 0:
            return v
        return jnp.concatenate([v[k:], v[:k]], axis=0)

    def kernel(p1_ref, m2_ref, w1_ref, b1_ref, w2_ref, b2_ref, w3_ref, b3_ref,
               w4_ref, b4_ref, w5_ref, b5_ref, w6_ref, b6_ref, o_ref, h2_sc):

        def mmb(a, w_ref):
            # bf16 MXU operands, f32 accumulation.
            return jnp.dot(a.astype(jnp.bfloat16), w_ref[...],
                           preferred_element_type=jnp.float32)

        relu = lambda v: jnp.maximum(v, 0.0)

        # conv1 (2x2, s=2) + ReLU: host-packed patches -> one GEMM.
        h1 = relu(mmb(p1_ref[...], w1_ref) + b1_ref[...])            # (R1, 32)

        # conv2 (3x3, s=1, pad=1) + ReLU: 9 shifted copies of h1 (sublane shift
        # + edge/image-boundary mask) lane-concatenated -> one 288-deep GEMM.
        pieces = []
        for ky in range(3):
            for kx in range(3):
                d = ky * 3 + kx
                s = (ky - 1) * W1 + (kx - 1)
                pieces.append(roll_rows(h1, s) * m2_ref[d])
        lhs2 = jnp.concatenate(pieces, axis=1)                        # (R1, 288)
        h2 = relu(mmb(lhs2, w2_ref) + b2_ref[...])                    # (R1, 32)

        # conv3 (2x2, s=2) + ReLU: gather the 4 taps of every stride-2 output
        # position with strided sublane reads from VMEM scratch, lane-concat,
        # one 128-deep GEMM.  Rows come out in (xo, b, yo) order — undone on
        # the host for free (conv4-6 are 1x1 so row order is irrelevant here).
        h2_sc[...] = h2
        groups = []
        for xo in range(W3):
            taps = []
            for ky in range(2):
                for kx in range(2):
                    start = 2 * xo + ky * W1 + kx
                    taps.append(h2_sc[pl.ds(start, RG, stride=2 * W1), :])
            groups.append(jnp.concatenate(taps, axis=1))              # (RG, 128)
        lhs3 = jnp.concatenate(groups, axis=0)                        # (Bt*M3, 128)
        h = relu(mmb(lhs3, w3_ref) + b3_ref[...])                     # (Bt*M3, 64)

        # conv4 / conv5 / conv6 (1x1) + ReLU: chained GEMMs, all in VMEM.
        h = relu(mmb(h, w4_ref) + b4_ref[...])
        h = relu(mmb(h, w5_ref) + b5_ref[...])
        h = relu(mmb(h, w6_ref) + b6_ref[...])                        # (Bt*M3, 64)

        # Lane-dense store: put the W3 column groups side by side in lanes so a
        # stored row is W3*64 (>=128) lanes wide instead of 64.
        o_ref[0] = jnp.concatenate(
            [h[xo * RG:(xo + 1) * RG, :] for xo in range(W3)], axis=1)

    return kernel


# ------------------------- forward pass -------------------------

@jax.jit
def patch_key_forward(x_nchw, params):
    """Equivalent of PatchKey.forward (per-sample loop + cat == batched convs)."""
    B, C, H, W = x_nchw.shape
    assert H % 4 == 0 and W % 4 == 0
    H1, W1 = H // 2, W // 2
    H3, W3 = H1 // 2, W1 // 2
    M1 = H1 * W1

    # Batch tiling: fold Bt images into the GEMM rows per grid step, but keep
    # >= 2 "parallel" grid steps when possible so v7x's two TCs both get work.
    grid_b = 2 if (B % 2 == 0 and B >= 2) else B
    Bt = B // grid_b

    w1, b1 = params['conv1']; w2, b2 = params['conv2']; w3, b3 = params['conv3']
    w4, b4 = params['conv4']; w5, b5 = params['conv5']; w6, b6 = params['conv6']
    n_out = w6.shape[0]
    c2 = w2.shape[0]
    bf = jnp.bfloat16

    x = jnp.transpose(x_nchw, (0, 2, 3, 1)).astype(jnp.float32)        # NHWC
    p1 = space_to_depth2(x).reshape(B * M1, 4 * C).astype(bf)          # conv1 patches

    m2 = jnp.asarray(conv2_edge_mask(H1, W1, Bt))                      # (9, Bt*M1, 1)

    const_args = (
        m2,
        oihw_to_mat(w1).astype(bf), b1.reshape(1, -1),
        oihw_to_mat(w2).astype(bf), b2.reshape(1, -1),
        oihw_to_mat(w3).astype(bf), b3.reshape(1, -1),
        oihw_to_mat(w4).astype(bf), b4.reshape(1, -1),
        oihw_to_mat(w5).astype(bf), b5.reshape(1, -1),
        oihw_to_mat(w6).astype(bf), b6.reshape(1, -1),
    )

    in_specs = ([pl.BlockSpec((Bt * M1, 4 * C), lambda g: (g, 0))]
                + [pl.BlockSpec(a.shape, lambda g, _n=a.ndim: (0,) * _n)
                   for a in const_args])

    out = pl.pallas_call(
        _make_kernel(Bt, H1, W1),
        out_shape=jax.ShapeDtypeStruct((grid_b, Bt * H3, W3 * n_out), jnp.float32),
        grid_spec=pltpu.PrefetchScalarGridSpec(
            num_scalar_prefetch=0,
            grid=(grid_b,),
            in_specs=in_specs,
            out_specs=pl.BlockSpec((1, Bt * H3, W3 * n_out), lambda g: (g, 0, 0)),
            scratch_shapes=[pltpu.VMEM((Bt * M1, c2), jnp.float32)],
        ),
        compiler_params=pltpu.CompilerParams(
            dimension_semantics=("parallel",)),
    )(p1, *const_args)

    # Undo the kernel's output layout: rows=(b_local, yo), lanes=(xo, c) -> NCHW.
    out = out.reshape(grid_b, Bt, H3, W3, n_out)
    out = jnp.transpose(out, (0, 1, 4, 2, 3)).reshape(B, n_out, H3, W3)
    return out


# ------------------------- params + pure-JAX reference -------------------------

def init_params(key):
    """Deterministic init matching PyTorch Conv2d default U(-1/sqrt(fan_in), +)."""
    specs = {
        'conv1': (32, 3, 2, 2),
        'conv2': (32, 32, 3, 3),
        'conv3': (64, 32, 2, 2),
        'conv4': (32, 64, 1, 1),
        'conv5': (32, 32, 1, 1),
        'conv6': (64, 32, 1, 1),
    }
    params = {}
    keys = jax.random.split(key, 2 * len(specs))
    for idx, (name, (o, i, kh, kw)) in enumerate(specs.items()):
        bound = 1.0 / np.sqrt(i * kh * kw)
        w = jax.random.uniform(keys[2 * idx], (o, i, kh, kw), jnp.float32,
                               -bound, bound)
        b = jax.random.uniform(keys[2 * idx + 1], (o,), jnp.float32,
                               -bound, bound)
        params[name] = (w, b)
    return params


def reference_forward(x, params):
    def conv(x, w, b, stride, padding):
        y = jax.lax.conv_general_dilated(
            x, w, window_strides=(stride, stride), padding=padding,
            dimension_numbers=('NCHW', 'OIHW', 'NCHW'),
            precision=jax.lax.Precision.HIGHEST)
        return jax.nn.relu(y + b.reshape(1, -1, 1, 1))

    h = conv(x, *params['conv1'], 2, 'VALID')
    h = conv(h, *params['conv2'], 1, [(1, 1), (1, 1)])
    h = conv(h, *params['conv3'], 2, 'VALID')
    h = conv(h, *params['conv4'], 1, 'VALID')
    h = conv(h, *params['conv5'], 1, 'VALID')
    h = conv(h, *params['conv6'], 1, 'VALID')
    return h


if __name__ == "__main__":
    key = jax.random.PRNGKey(0)
    kx, kp = jax.random.split(key)
    x = jax.random.normal(kx, (2, 3, 16, 16), jnp.float32)   # NCHW like PyTorch
    params = init_params(kp)

    out = jax.block_until_ready(patch_key_forward(x, params))
    assert out.shape == (2, 64, 4, 4), out.shape

    ref = jax.block_until_ready(reference_forward(x, params))
    # bf16 MXU operands vs. the f32 HIGHEST reference: ~1% relative error after
    # six layers is expected; this is a numerics check, not a bit-match.
    np.testing.assert_allclose(np.asarray(out), np.asarray(ref),
                               rtol=3e-2, atol=1.5e-2)
    print("KERNEL_OK")
</pallas_src>

<mosaic_0001>
module attributes {stable_mosaic.version = 11 : i64} {
  func.func @kernel(%arg0: i32, %arg1: memref<64x12xbf16, #tpu.memory_space<vmem>>, %arg2: memref<9x64x1xf32, #tpu.memory_space<vmem>>, %arg3: memref<12x32xbf16, #tpu.memory_space<vmem>>, %arg4: memref<1x32xf32, #tpu.memory_space<vmem>>, %arg5: memref<288x32xbf16, #tpu.memory_space<vmem>>, %arg6: memref<1x32xf32, #tpu.memory_space<vmem>>, %arg7: memref<128x64xbf16, #tpu.memory_space<vmem>>, %arg8: memref<1x64xf32, #tpu.memory_space<vmem>>, %arg9: memref<64x32xbf16, #tpu.memory_space<vmem>>, %arg10: memref<1x32xf32, #tpu.memory_space<vmem>>, %arg11: memref<32x32xbf16, #tpu.memory_space<vmem>>, %arg12: memref<1x32xf32, #tpu.memory_space<vmem>>, %arg13: memref<32x64xbf16, #tpu.memory_space<vmem>>, %arg14: memref<1x64xf32, #tpu.memory_space<vmem>>, %arg15: memref<1x4x256xf32, #tpu.memory_space<vmem>>, %arg16: memref<64x32xf32, #tpu.memory_space<vmem>>) attributes {dimension_semantics = [#tpu.dimension_semantics<parallel>], iteration_bounds = array<i64: 2>, scalar_prefetch = 0 : i64, scratch_operands = 1 : i64, tpu.core_type = #tpu.core_type<tc>, window_params = [{transform_indices = @transform_0, window_bounds = array<i64: 64, 12>}, {pipeline_mode = #tpu.pipeline_mode<synchronous>, transform_indices = @transform_1, window_bounds = array<i64: 9, 64, 1>}, {pipeline_mode = #tpu.pipeline_mode<synchronous>, transform_indices = @transform_2, window_bounds = array<i64: 12, 32>}, {pipeline_mode = #tpu.pipeline_mode<synchronous>, transform_indices = @transform_3, window_bounds = array<i64: 1, 32>}, {pipeline_mode = #tpu.pipeline_mode<synchronous>, transform_indices = @transform_4, window_bounds = array<i64: 288, 32>}, {pipeline_mode = #tpu.pipeline_mode<synchronous>, transform_indices = @transform_5, window_bounds = array<i64: 1, 32>}, {pipeline_mode = #tpu.pipeline_mode<synchronous>, transform_indices = @transform_6, window_bounds = array<i64: 128, 64>}, {pipeline_mode = #tpu.pipeline_mode<synchronous>, transform_indices = @transform_7, window_bounds = array<i64: 1, 64>}, {pipeline_mode = #tpu.pipeline_mode<synchronous>, transform_indices = @transform_8, window_bounds = array<i64: 64, 32>}, {pipeline_mode = #tpu.pipeline_mode<synchronous>, transform_indices = @transform_9, window_bounds = array<i64: 1, 32>}, {pipeline_mode = #tpu.pipeline_mode<synchronous>, transform_indices = @transform_10, window_bounds = array<i64: 32, 32>}, {pipeline_mode = #tpu.pipeline_mode<synchronous>, transform_indices = @transform_11, window_bounds = array<i64: 1, 32>}, {pipeline_mode = #tpu.pipeline_mode<synchronous>, transform_indices = @transform_12, window_bounds = array<i64: 32, 64>}, {pipeline_mode = #tpu.pipeline_mode<synchronous>, transform_indices = @transform_13, window_bounds = array<i64: 1, 64>}, {transform_indices = @transform_14, window_bounds = array<i64: 1, 4, 256>}]} {
    %c0 = arith.constant 0 : index
    %c0_0 = arith.constant 0 : index
    %0 = vector.load %arg1[%c0, %c0_0] : memref<64x12xbf16, #tpu.memory_space<vmem>>, vector<64x12xbf16>
    %c0_1 = arith.constant 0 : index
    %c0_2 = arith.constant 0 : index
    %1 = vector.load %arg3[%c0_1, %c0_2] : memref<12x32xbf16, #tpu.memory_space<vmem>>, vector<12x32xbf16>
    %cst = arith.constant dense<0.000000e+00> : vector<64x32xf32>
    %2 = tpu.matmul %0, %1, %cst {dimension_numbers = #tpu.dot_dimension_numbers<[1], [0], [0], [1], [0, 0, 1, 1], [], []>} : vector<64x12xbf16>, vector<12x32xbf16>, vector<64x32xf32> -> vector<64x32xf32>
    %c0_3 = arith.constant 0 : index
    %c0_4 = arith.constant 0 : index
    %3 = vector.load %arg4[%c0_3, %c0_4] : memref<1x32xf32, #tpu.memory_space<vmem>>, vector<1x32xf32>
    %4 = vector.broadcast %3 : vector<1x32xf32> to vector<64x32xf32>
    %5 = arith.addf %2, %4 : vector<64x32xf32>
    %cst_5 = arith.constant 0.000000e+00 : f32
    %6 = vector.broadcast %cst_5 : f32 to vector<64x32xf32>
    %7 = arith.maximumf %5, %6 : vector<64x32xf32>
    %8 = vector.extract_strided_slice %7 {offsets = [55, 0], sizes = [9, 32], strides = [1, 1]} : vector<64x32xf32> to vector<9x32xf32>
    %9 = vector.extract_strided_slice %7 {offsets = [0, 0], sizes = [55, 32], strides = [1, 1]} : vector<64x32xf32> to vector<55x32xf32>
    %10 = tpu.concatenate %8, %9 in 0 : vector<9x32xf32>, vector<55x32xf32> -> vector<64x32xf32>
    %c0_6 = arith.constant 0 : index
    %c0_7 = arith.constant 0 : index
    %c0_8 = arith.constant 0 : index
    %11 = vector.load %arg2[%c0_6, %c0_7, %c0_8] : memref<9x64x1xf32, #tpu.memory_space<vmem>>, vector<1x64x1xf32>
    %12 = vector.shape_cast %11 : vector<1x64x1xf32> to vector<64x1xf32>
    %13 = vector.broadcast %12 : vector<64x1xf32> to vector<64x32xf32>
    %14 = arith.mulf %10, %13 : vector<64x32xf32>
    %15 = vector.extract_strided_slice %7 {offsets = [56, 0], sizes = [8, 32], strides = [1, 1]} : vector<64x32xf32> to vector<8x32xf32>
    %16 = vector.extract_strided_slice %7 {offsets = [0, 0], sizes = [56, 32], strides = [1, 1]} : vector<64x32xf32> to vector<56x32xf32>
    %17 = tpu.concatenate %15, %16 in 0 : vector<8x32xf32>, vector<56x32xf32> -> vector<64x32xf32>
    %c1 = arith.constant 1 : index
    %c0_9 = arith.constant 0 : index
    %c0_10 = arith.constant 0 : index
    %18 = vector.load %arg2[%c1, %c0_9, %c0_10] : memref<9x64x1xf32, #tpu.memory_space<vmem>>, vector<1x64x1xf32>
    %19 = vector.shape_cast %18 : vector<1x64x1xf32> to vector<64x1xf32>
    %20 = vector.broadcast %19 : vector<64x1xf32> to vector<64x32xf32>
    %21 = arith.mulf %17, %20 : vector<64x32xf32>
    %22 = vector.extract_strided_slice %7 {offsets = [57, 0], sizes = [7, 32], strides = [1, 1]} : vector<64x32xf32> to vector<7x32xf32>
    %23 = vector.extract_strided_slice %7 {offsets = [0, 0], sizes = [57, 32], strides = [1, 1]} : vector<64x32xf32> to vector<57x32xf32>
    %24 = tpu.concatenate %22, %23 in 0 : vector<7x32xf32>, vector<57x32xf32> -> vector<64x32xf32>
    %c2 = arith.constant 2 : index
    %c0_11 = arith.constant 0 : index
    %c0_12 = arith.constant 0 : index
    %25 = vector.load %arg2[%c2, %c0_11, %c0_12] : memref<9x64x1xf32, #tpu.memory_space<vmem>>, vector<1x64x1xf32>
    %26 = vector.shape_cast %25 : vector<1x64x1xf32> to vector<64x1xf32>
    %27 = vector.broadcast %26 : vector<64x1xf32> to vector<64x32xf32>
    %28 = arith.mulf %24, %27 : vector<64x32xf32>
    %29 = vector.extract_strided_slice %7 {offsets = [63, 0], sizes = [1, 32], strides = [1, 1]} : vector<64x32xf32> to vector<1x32xf32>
    %30 = vector.extract_strided_slice %7 {offsets = [0, 0], sizes = [63, 32], strides = [1, 1]} : vector<64x32xf32> to vector<63x32xf32>
    %31 = tpu.concatenate %29, %30 in 0 : vector<1x32xf32>, vector<63x32xf32> -> vector<64x32xf32>
    %c3 = arith.constant 3 : index
    %c0_13 = arith.constant 0 : index
    %c0_14 = arith.constant 0 : index
    %32 = vector.load %arg2[%c3, %c0_13, %c0_14] : memref<9x64x1xf32, #tpu.memory_space<vmem>>, vector<1x64x1xf32>
    %33 = vector.shape_cast %32 : vector<1x64x1xf32> to vector<64x1xf32>
    %34 = vector.broadcast %33 : vector<64x1xf32> to vector<64x32xf32>
    %35 = arith.mulf %31, %34 : vector<64x32xf32>
    %c4 = arith.constant 4 : index
    %c0_15 = arith.constant 0 : index
    %c0_16 = arith.constant 0 : index
    %36 = vector.load %arg2[%c4, %c0_15, %c0_16] : memref<9x64x1xf32, #tpu.memory_space<vmem>>, vector<1x64x1xf32>
    %37 = vector.shape_cast %36 : vector<1x64x1xf32> to vector<64x1xf32>
    %38 = vector.broadcast %37 : vector<64x1xf32> to vector<64x32xf32>
    %39 = arith.mulf %7, %38 : vector<64x32xf32>
    %40 = vector.extract_strided_slice %7 {offsets = [1, 0], sizes = [63, 32], strides = [1, 1]} : vector<64x32xf32> to vector<63x32xf32>
    %41 = vector.extract_strided_slice %7 {offsets = [0, 0], sizes = [1, 32], strides = [1, 1]} : vector<64x32xf32> to vector<1x32xf32>
    %42 = tpu.concatenate %40, %41 in 0 : vector<63x32xf32>, vector<1x32xf32> -> vector<64x32xf32>
    %c5 = arith.constant 5 : index
    %c0_17 = arith.constant 0 : index
    %c0_18 = arith.constant 0 : index
    %43 = vector.load %arg2[%c5, %c0_17, %c0_18] : memref<9x64x1xf32, #tpu.memory_space<vmem>>, vector<1x64x1xf32>
    %44 = vector.shape_cast %43 : vector<1x64x1xf32> to vector<64x1xf32>
    %45 = vector.broadcast %44 : vector<64x1xf32> to vector<64x32xf32>
    %46 = arith.mulf %42, %45 : vector<64x32xf32>
    %47 = vector.extract_strided_slice %7 {offsets = [7, 0], sizes = [57, 32], strides = [1, 1]} : vector<64x32xf32> to vector<57x32xf32>
    %48 = vector.extract_strided_slice %7 {offsets = [0, 0], sizes = [7, 32], strides = [1, 1]} : vector<64x32xf32> to vector<7x32xf32>
    %49 = tpu.concatenate %47, %48 in 0 : vector<57x32xf32>, vector<7x32xf32> -> vector<64x32xf32>
    %c6 = arith.constant 6 : index
    %c0_19 = arith.constant 0 : index
    %c0_20 = arith.constant 0 : index
    %50 = vector.load %arg2[%c6, %c0_19, %c0_20] : memref<9x64x1xf32, #tpu.memory_space<vmem>>, vector<1x64x1xf32>
    %51 = vector.shape_cast %50 : vector<1x64x1xf32> to vector<64x1xf32>
    %52 = vector.broadcast %51 : vector<64x1xf32> to vector<64x32xf32>
    %53 = arith.mulf %49, %52 : vector<64x32xf32>
    %54 = vector.extract_strided_slice %7 {offsets = [8, 0], sizes = [56, 32], strides = [1, 1]} : vector<64x32xf32> to vector<56x32xf32>
    %55 = vector.extract_strided_slice %7 {offsets = [0, 0], sizes = [8, 32], strides = [1, 1]} : vector<64x32xf32> to vector<8x32xf32>
    %56 = tpu.concatenate %54, %55 in 0 : vector<56x32xf32>, vector<8x32xf32> -> vector<64x32xf32>
    %c7 = arith.constant 7 : index
    %c0_21 = arith.constant 0 : index
    %c0_22 = arith.constant 0 : index
    %57 = vector.load %arg2[%c7, %c0_21, %c0_22] : memref<9x64x1xf32, #tpu.memory_space<vmem>>, vector<1x64x1xf32>
    %58 = vector.shape_cast %57 : vector<1x64x1xf32> to vector<64x1xf32>
    %59 = vector.broadcast %58 : vector<64x1xf32> to vector<64x32xf32>
    %60 = arith.mulf %56, %59 : vector<64x32xf32>
    %61 = vector.extract_strided_slice %7 {offsets = [9, 0], sizes = [55, 32], strides = [1, 1]} : vector<64x32xf32> to vector<55x32xf32>
    %62 = vector.extract_strided_slice %7 {offsets = [0, 0], sizes = [9, 32], strides = [1, 1]} : vector<64x32xf32> to vector<9x32xf32>
    %63 = tpu.concatenate %61, %62 in 0 : vector<55x32xf32>, vector<9x32xf32> -> vector<64x32xf32>
    %c8 = arith.constant 8 : index
    %c0_23 = arith.constant 0 : index
    %c0_24 = arith.constant 0 : index
    %64 = vector.load %arg2[%c8, %c0_23, %c0_24] : memref<9x64x1xf32, #tpu.memory_space<vmem>>, vector<1x64x1xf32>
    %65 = vector.shape_cast %64 : vector<1x64x1xf32> to vector<64x1xf32>
    %66 = vector.broadcast %65 : vector<64x1xf32> to vector<64x32xf32>
    %67 = arith.mulf %63, %66 : vector<64x32xf32>
    %68 = tpu.concatenate %14, %21, %28, %35, %39, %46, %53, %60, %67 in 1 : vector<64x32xf32>, vector<64x32xf32>, vector<64x32xf32>, vector<64x32xf32>, vector<64x32xf32>, vector<64x32xf32>, vector<64x32xf32>, vector<64x32xf32>, vector<64x32xf32> -> vector<64x288xf32>
    %69 = arith.truncf %68 : vector<64x288xf32> to vector<64x288xbf16>
    %c0_25 = arith.constant 0 : index
    %c0_26 = arith.constant 0 : index
    %70 = vector.load %arg5[%c0_25, %c0_26] : memref<288x32xbf16, #tpu.memory_space<vmem>>, vector<288x32xbf16>
    %cst_27 = arith.constant dense<0.000000e+00> : vector<64x32xf32>
    %71 = tpu.matmul %69, %70, %cst_27 {dimension_numbers = #tpu.dot_dimension_numbers<[1], [0], [0], [1], [0, 0, 1, 1], [], []>} : vector<64x288xbf16>, vector<288x32xbf16>, vector<64x32xf32> -> vector<64x32xf32>
    %c0_28 = arith.constant 0 : index
    %c0_29 = arith.constant 0 : index
    %72 = vector.load %arg6[%c0_28, %c0_29] : memref<1x32xf32, #tpu.memory_space<vmem>>, vector<1x32xf32>
    %73 = vector.broadcast %72 : vector<1x32xf32> to vector<64x32xf32>
    %74 = arith.addf %71, %73 : vector<64x32xf32>
    %cst_30 = arith.constant 0.000000e+00 : f32
    %75 = vector.broadcast %cst_30 : f32 to vector<64x32xf32>
    %76 = arith.maximumf %74, %75 : vector<64x32xf32>
    %c0_31 = arith.constant 0 : index
    %c0_32 = arith.constant 0 : index
    %77 = vector.load %arg16[%c0_31, %c0_32] : memref<64x32xf32, #tpu.memory_space<vmem>>, vector<64x32xf32>
    tpu.vector_store %arg16[%c0_31, %c0_32], %76 {strides = array<i32>} : memref<64x32xf32, #tpu.memory_space<vmem>>, vector<64x32xf32>,
    %c0_33 = arith.constant 0 : index
    %c0_34 = arith.constant 0 : index
    %78 = tpu.strided_load %arg16[%c0_33, %c0_34] {strides = array<i32: 16, 1>} : memref<64x32xf32, #tpu.memory_space<vmem>>, vector<4x32xf32>
    %c1_35 = arith.constant 1 : index
    %c0_36 = arith.constant 0 : index
    %79 = tpu.strided_load %arg16[%c1_35, %c0_36] {strides = array<i32: 16, 1>} : memref<64x32xf32, #tpu.memory_space<vmem>>, vector<4x32xf32>
    %c8_37 = arith.constant 8 : index
    %c0_38 = arith.constant 0 : index
    %80 = tpu.strided_load %arg16[%c8_37, %c0_38] {strides = array<i32: 16, 1>} : memref<64x32xf32, #tpu.memory_space<vmem>>, vector<4x32xf32>
    %c9 = arith.constant 9 : index
    %c0_39 = arith.constant 0 : index
    %81 = tpu.strided_load %arg16[%c9, %c0_39] {strides = array<i32: 16, 1>} : memref<64x32xf32, #tpu.memory_space<vmem>>, vector<4x32xf32>
    %82 = tpu.concatenate %78, %79, %80, %81 in 1 : vector<4x32xf32>, vector<4x32xf32>, vector<4x32xf32>, vector<4x32xf32> -> vector<4x128xf32>
    %c2_40 = arith.constant 2 : index
    %c0_41 = arith.constant 0 : index
    %83 = tpu.strided_load %arg16[%c2_40, %c0_41] {strides = array<i32: 16, 1>} : memref<64x32xf32, #tpu.memory_space<vmem>>, vector<4x32xf32>
    %c3_42 = arith.constant 3 : index
    %c0_43 = arith.constant 0 : index
    %84 = tpu.strided_load %arg16[%c3_42, %c0_43] {strides = array<i32: 16, 1>} : memref<64x32xf32, #tpu.memory_space<vmem>>, vector<4x32xf32>
    %c10 = arith.constant 10 : index
    %c0_44 = arith.constant 0 : index
    %85 = tpu.strided_load %arg16[%c10, %c0_44] {strides = array<i32: 16, 1>} : memref<64x32xf32, #tpu.memory_space<vmem>>, vector<4x32xf32>
    %c11 = arith.constant 11 : index
    %c0_45 = arith.constant 0 : index
    %86 = tpu.strided_load %arg16[%c11, %c0_45] {strides = array<i32: 16, 1>} : memref<64x32xf32, #tpu.memory_space<vmem>>, vector<4x32xf32>
    %87 = tpu.concatenate %83, %84, %85, %86 in 1 : vector<4x32xf32>, vector<4x32xf32>, vector<4x32xf32>, vector<4x32xf32> -> vector<4x128xf32>
    %c4_46 = arith.constant 4 : index
    %c0_47 = arith.constant 0 : index
    %88 = tpu.strided_load %arg16[%c4_46, %c0_47] {strides = array<i32: 16, 1>} : memref<64x32xf32, #tpu.memory_space<vmem>>, vector<4x32xf32>
    %c5_48 = arith.constant 5 : index
    %c0_49 = arith.constant 0 : index
    %89 = tpu.strided_load %arg16[%c5_48, %c0_49] {strides = array<i32: 16, 1>} : memref<64x32xf32, #tpu.memory_space<vmem>>, vector<4x32xf32>
    %c12 = arith.constant 12 : index
    %c0_50 = arith.constant 0 : index
    %90 = tpu.strided_load %arg16[%c12, %c0_50] {strides = array<i32: 16, 1>} : memref<64x32xf32, #tpu.memory_space<vmem>>, vector<4x32xf32>
    %c13 = arith.constant 13 : index
    %c0_51 = arith.constant 0 : index
    %91 = tpu.strided_load %arg16[%c13, %c0_51] {strides = array<i32: 16, 1>} : memref<64x32xf32, #tpu.memory_space<vmem>>, vector<4x32xf32>
    %92 = tpu.concatenate %88, %89, %90, %91 in 1 : vector<4x32xf32>, vector<4x32xf32>, vector<4x32xf32>, vector<4x32xf32> -> vector<4x128xf32>
    %c6_52 = arith.constant 6 : index
    %c0_53 = arith.constant 0 : index
    %93 = tpu.strided_load %arg16[%c6_52, %c0_53] {strides = array<i32: 16, 1>} : memref<64x32xf32, #tpu.memory_space<vmem>>, vector<4x32xf32>
    %c7_54 = arith.constant 7 : index
    %c0_55 = arith.constant 0 : index
    %94 = tpu.strided_load %arg16[%c7_54, %c0_55] {strides = array<i32: 16, 1>} : memref<64x32xf32, #tpu.memory_space<vmem>>, vector<4x32xf32>
    %c14 = arith.constant 14 : index
    %c0_56 = arith.constant 0 : index
    %95 = tpu.strided_load %arg16[%c14, %c0_56] {strides = array<i32: 16, 1>} : memref<64x32xf32, #tpu.memory_space<vmem>>, vector<4x32xf32>
    %c15 = arith.constant 15 : index
    %c0_57 = arith.constant 0 : index
    %96 = tpu.strided_load %arg16[%c15, %c0_57] {strides = array<i32: 16, 1>} : memref<64x32xf32, #tpu.memory_space<vmem>>, vector<4x32xf32>
    %97 = tpu.concatenate %93, %94, %95, %96 in 1 : vector<4x32xf32>, vector<4x32xf32>, vector<4x32xf32>, vector<4x32xf32> -> vector<4x128xf32>
    %98 = tpu.concatenate %82, %87, %92, %97 in 0 : vector<4x128xf32>, vector<4x128xf32>, vector<4x128xf32>, vector<4x128xf32> -> vector<16x128xf32>
    %99 = arith.truncf %98 : vector<16x128xf32> to vector<16x128xbf16>
    %c0_58 = arith.constant 0 : index
    %c0_59 = arith.constant 0 : index
    %100 = vector.load %arg7[%c0_58, %c0_59] : memref<128x64xbf16, #tpu.memory_space<vmem>>, vector<128x64xbf16>
    %cst_60 = arith.constant dense<0.000000e+00> : vector<16x64xf32>
    %101 = tpu.matmul %99, %100, %cst_60 {dimension_numbers = #tpu.dot_dimension_numbers<[1], [0], [0], [1], [0, 0, 1, 1], [], []>} : vector<16x128xbf16>, vector<128x64xbf16>, vector<16x64xf32> -> vector<16x64xf32>
    %c0_61 = arith.constant 0 : index
    %c0_62 = arith.constant 0 : index
    %102 = vector.load %arg8[%c0_61, %c0_62] : memref<1x64xf32, #tpu.memory_space<vmem>>, vector<1x64xf32>
    %103 = vector.broadcast %102 : vector<1x64xf32> to vector<16x64xf32>
    %104 = arith.addf %101, %103 : vector<16x64xf32>
    %cst_63 = arith.constant 0.000000e+00 : f32
    %105 = vector.broadcast %cst_63 : f32 to vector<16x64xf32>
    %106 = arith.maximumf %104, %105 : vector<16x64xf32>
    %107 = arith.truncf %106 : vector<16x64xf32> to vector<16x64xbf16>
    %c0_64 = arith.constant 0 : index
    %c0_65 = arith.constant 0 : index
    %108 = vector.load %arg9[%c0_64, %c0_65] : memref<64x32xbf16, #tpu.memory_space<vmem>>, vector<64x32xbf16>
    %cst_66 = arith.constant dense<0.000000e+00> : vector<16x32xf32>
    %109 = tpu.matmul %107, %108, %cst_66 {dimension_numbers = #tpu.dot_dimension_numbers<[1], [0], [0], [1], [0, 0, 1, 1], [], []>} : vector<16x64xbf16>, vector<64x32xbf16>, vector<16x32xf32> -> vector<16x32xf32>
    %c0_67 = arith.constant 0 : index
    %c0_68 = arith.constant 0 : index
    %110 = vector.load %arg10[%c0_67, %c0_68] : memref<1x32xf32, #tpu.memory_space<vmem>>, vector<1x32xf32>
    %111 = vector.broadcast %110 : vector<1x32xf32> to vector<16x32xf32>
    %112 = arith.addf %109, %111 : vector<16x32xf32>
    %cst_69 = arith.constant 0.000000e+00 : f32
    %113 = vector.broadcast %cst_69 : f32 to vector<16x32xf32>
    %114 = arith.maximumf %112, %113 : vector<16x32xf32>
    %115 = arith.truncf %114 : vector<16x32xf32> to vector<16x32xbf16>
    %c0_70 = arith.constant 0 : index
    %c0_71 = arith.constant 0 : index
    %116 = vector.load %arg11[%c0_70, %c0_71] : memref<32x32xbf16, #tpu.memory_space<vmem>>, vector<32x32xbf16>
    %cst_72 = arith.constant dense<0.000000e+00> : vector<16x32xf32>
    %117 = tpu.matmul %115, %116, %cst_72 {dimension_numbers = #tpu.dot_dimension_numbers<[1], [0], [0], [1], [0, 0, 1, 1], [], []>} : vector<16x32xbf16>, vector<32x32xbf16>, vector<16x32xf32> -> vector<16x32xf32>
    %c0_73 = arith.constant 0 : index
    %c0_74 = arith.constant 0 : index
    %118 = vector.load %arg12[%c0_73, %c0_74] : memref<1x32xf32, #tpu.memory_space<vmem>>, vector<1x32xf32>
    %119 = vector.broadcast %118 : vector<1x32xf32> to vector<16x32xf32>
    %120 = arith.addf %117, %119 : vector<16x32xf32>
    %cst_75 = arith.constant 0.000000e+00 : f32
    %121 = vector.broadcast %cst_75 : f32 to vector<16x32xf32>
    %122 = arith.maximumf %120, %121 : vector<16x32xf32>
    %123 = arith.truncf %122 : vector<16x32xf32> to vector<16x32xbf16>
    %c0_76 = arith.constant 0 : index
    %c0_77 = arith.constant 0 : index
    %124 = vector.load %arg13[%c0_76, %c0_77] : memref<32x64xbf16, #tpu.memory_space<vmem>>, vector<32x64xbf16>
    %cst_78 = arith.constant dense<0.000000e+00> : vector<16x64xf32>
    %125 = tpu.matmul %123, %124, %cst_78 {dimension_numbers = #tpu.dot_dimension_numbers<[1], [0], [0], [1], [0, 0, 1, 1], [], []>} : vector<16x32xbf16>, vector<32x64xbf16>, vector<16x64xf32> -> vector<16x64xf32>
    %c0_79 = arith.constant 0 : index
    %c0_80 = arith.constant 0 : index
    %126 = vector.load %arg14[%c0_79, %c0_80] : memref<1x64xf32, #tpu.memory_space<vmem>>, vector<1x64xf32>
    %127 = vector.broadcast %126 : vector<1x64xf32> to vector<16x64xf32>
    %128 = arith.addf %125, %127 : vector<16x64xf32>
    %cst_81 = arith.constant 0.000000e+00 : f32
    %129 = vector.broadcast %cst_81 : f32 to vector<16x64xf32>
    %130 = arith.maximumf %128, %129 : vector<16x64xf32>
    %131 = vector.extract_strided_slice %130 {offsets = [0, 0], sizes = [4, 64], strides = [1, 1]} : vector<16x64xf32> to vector<4x64xf32>
    %132 = vector.extract_strided_slice %130 {offsets = [4, 0], sizes = [4, 64], strides = [1, 1]} : vector<16x64xf32> to vector<4x64xf32>
    %133 = vector.extract_strided_slice %130 {offsets = [8, 0], sizes = [4, 64], strides = [1, 1]} : vector<16x64xf32> to vector<4x64xf32>
    %134 = vector.extract_strided_slice %130 {offsets = [12, 0], sizes = [4, 64], strides = [1, 1]} : vector<16x64xf32> to vector<4x64xf32>
    %135 = tpu.concatenate %131, %132, %133, %134 in 1 : vector<4x64xf32>, vector<4x64xf32>, vector<4x64xf32>, vector<4x64xf32> -> vector<4x256xf32>
    %c0_82 = arith.constant 0 : index
    %c0_83 = arith.constant 0 : index
    %c0_84 = arith.constant 0 : index
    %136 = vector.load %arg15[%c0_82, %c0_83, %c0_84] : memref<1x4x256xf32, #tpu.memory_space<vmem>>, vector<1x4x256xf32>
    %137 = vector.shape_cast %136 : vector<1x4x256xf32> to vector<4x256xf32>
    %138 = vector.shape_cast %135 : vector<4x256xf32> to vector<1x4x256xf32>
    tpu.vector_store %arg15[%c0_82, %c0_83, %c0_84], %138 {strides = array<i32>} : memref<1x4x256xf32, #tpu.memory_space<vmem>>, vector<1x4x256xf32>,
    return
  }
  func.func @transform_0(%arg0: i32) -> (i32, i32) {
    %c0_i32 = arith.constant 0 : i32
    %c0_i32_0 = arith.constant 0 : i32
    return %arg0, %c0_i32 : i32, i32
  }
  func.func @transform_1(%arg0: i32) -> (i32, i32, i32) {
    %c0_i32 = arith.constant 0 : i32
    %c0_i32_0 = arith.constant 0 : i32
    %c0_i32_1 = arith.constant 0 : i32
    %c0_i32_2 = arith.constant 0 : i32
    return %c0_i32, %c0_i32_0, %c0_i32_1 : i32, i32, i32
  }
  func.func @transform_2(%arg0: i32) -> (i32, i32) {
    %c0_i32 = arith.constant 0 : i32
    %c0_i32_0 = arith.constant 0 : i32
    %c0_i32_1 = arith.constant 0 : i32
    return %c0_i32, %c0_i32_0 : i32, i32
  }
  func.func @transform_3(%arg0: i32) -> (i32, i32) {
    %c0_i32 = arith.constant 0 : i32
    %c0_i32_0 = arith.constant 0 : i32
    %c0_i32_1 = arith.constant 0 : i32
    return %c0_i32, %c0_i32_0 : i32, i32
  }
  func.func @transform_4(%arg0: i32) -> (i32, i32) {
    %c0_i32 = arith.constant 0 : i32
    %c0_i32_0 = arith.constant 0 : i32
    %c0_i32_1 = arith.constant 0 : i32
    return %c0_i32, %c0_i32_0 : i32, i32
  }
  func.func @transform_5(%arg0: i32) -> (i32, i32) {
    %c0_i32 = arith.constant 0 : i32
    %c0_i32_0 = arith.constant 0 : i32
    %c0_i32_1 = arith.constant 0 : i32
    return %c0_i32, %c0_i32_0 : i32, i32
  }
  func.func @transform_6(%arg0: i32) -> (i32, i32) {
    %c0_i32 = arith.constant 0 : i32
    %c0_i32_0 = arith.constant 0 : i32
    %c0_i32_1 = arith.constant 0 : i32
    return %c0_i32, %c0_i32_0 : i32, i32
  }
  func.func @transform_7(%arg0: i32) -> (i32, i32) {
    %c0_i32 = arith.constant 0 : i32
    %c0_i32_0 = arith.constant 0 : i32
    %c0_i32_1 = arith.constant 0 : i32
    return %c0_i32, %c0_i32_0 : i32, i32
  }
  func.func @transform_8(%arg0: i32) -> (i32, i32) {
    %c0_i32 = arith.constant 0 : i32
    %c0_i32_0 = arith.constant 0 : i32
    %c0_i32_1 = arith.constant 0 : i32
    return %c0_i32, %c0_i32_0 : i32, i32
  }
  func.func @transform_9(%arg0: i32) -> (i32, i32) {
    %c0_i32 = arith.constant 0 : i32
    %c0_i32_0 = arith.constant 0 : i32
    %c0_i32_1 = arith.constant 0 : i32
    return %c0_i32, %c0_i32_0 : i32, i32
  }
  func.func @transform_10(%arg0: i32) -> (i32, i32) {
    %c0_i32 = arith.constant 0 : i32
    %c0_i32_0 = arith.constant 0 : i32
    %c0_i32_1 = arith.constant 0 : i32
    return %c0_i32, %c0_i32_0 : i32, i32
  }
  func.func @transform_11(%arg0: i32) -> (i32, i32) {
    %c0_i32 = arith.constant 0 : i32
    %c0_i32_0 = arith.constant 0 : i32
    %c0_i32_1 = arith.constant 0 : i32
    return %c0_i32, %c0_i32_0 : i32, i32
  }
  func.func @transform_12(%arg0: i32) -> (i32, i32) {
    %c0_i32 = arith.constant 0 : i32
    %c0_i32_0 = arith.constant 0 : i32
    %c0_i32_1 = arith.constant 0 : i32
    return %c0_i32, %c0_i32_0 : i32, i32
  }
  func.func @transform_13(%arg0: i32) -> (i32, i32) {
    %c0_i32 = arith.constant 0 : i32
    %c0_i32_0 = arith.constant 0 : i32
    %c0_i32_1 = arith.constant 0 : i32
    return %c0_i32, %c0_i32_0 : i32, i32
  }
  func.func @transform_14(%arg0: i32) -> (i32, i32, i32) {
    %c0_i32 = arith.constant 0 : i32
    %c0_i32_0 = arith.constant 0 : i32
    %c0_i32_1 = arith.constant 0 : i32
    return %arg0, %c0_i32, %c0_i32_0 : i32, i32, i32
  }
}

</mosaic_0001>

<bundles_post_ra>
// kernel: patch_key_forward.1
= control target key start
LH: loop header
LB: loop body
LE: loop exit
PB: predicated region body
PF: predicated region fallthrough
CT: control target
= control target key end

     0   :  { %s2620_s29 = smov 0   ;;  %s3414_s0 = inlined_call_operand.vmem [shape: bf16[128,12], index: 0, kind: input, shape index: {}]   ;;  %s3415_s1 = inlined_call_operand.vmem [shape: f32[9,64,1], index: 1, kind: input, shape index: {}]   ;;  %s3416_s2 = inlined_call_operand.vmem [shape: bf16[12,32], index: 2, kind: input, shape index: {}]   ;;  %s3417_s3 = inlined_call_operand.vmem [shape: f32[1,32], index: 3, kind: input, shape index: {}]   ;;  %s3418_s4 = inlined_call_operand.vmem [shape: bf16[288,32], index: 4, kind: input, shape index: {}]   ;;  %s3419_s5 = inlined_call_operand.vmem [shape: f32[1,32], index: 5, kind: input, shape index: {}]   ;;  %s3420_s6 = inlined_call_operand.vmem [shape: bf16[128,64], index: 6, kind: input, shape index: {}]   ;;  %s3421_s7 = inlined_call_operand.vmem [shape: f32[1,64], index: 7, kind: input, shape index: {}]   ;;  %s3422_s8 = inlined_call_operand.vmem [shape: bf16[64,32], index: 8, kind: input, shape index: {}]   ;;  %s3423_s9 = inlined_call_operand.vmem [shape: f32[1,32], index: 9, kind: input, shape index: {}]   ;;  %s3424_s10 = inlined_call_operand.vmem [shape: bf16[32,32], index: 10, kind: input, shape index: {}]   ;;  %s3425_s11 = inlined_call_operand.vmem [shape: f32[1,32], index: 11, kind: input, shape index: {}]   ;;  %s3426_s12 = inlined_call_operand.vmem [shape: bf16[32,64], index: 12, kind: input, shape index: {}]   ;;  %s3427_s13 = inlined_call_operand.vmem [shape: f32[1,64], index: 13, kind: input, shape index: {}]   ;;  %s3428_s14 = inlined_call_operand.vmem [shape: f32[2,4,256], index: 14, kind: output, shape index: {}]  }
   0x1 LB: > { %s2626_s30 = sadd.s32 4294967295, %s2539_s29   ;;  %p2084_p0 = scmp.ge.s32.totalorder %s2539_s29, 1  ;;  %s2539_s29 = sphi %s2620_s29, %s24_s29  }
   0x2   : > { %p413_p1 = scmp.lt.s32.totalorder %s2539_s29, 3 }
   0x4   : > { %p414_p2 = pnand %p2084_p0, %p413_p1 }
   0x5   : > { %s2085_s21 = sshll.u32 (!%p414_p2), %s2626_s30, 3  ;;  %s2542_s19 = smov (!%p414_p2), 96  }
   0x6   : > { %417 = sbr.rel (%p414_p2) target bundleno = 1375 (0x55f), region = 76  ;;  %p460_p3 = scmp.lt.s32.totalorder (!%p414_p2), %s2085_s21, 15 }
   0x7   : > { %s2543_s22 = smov (!%p414_p2), 32   ;;  %s2544_s24 = smov (!%p414_p2), 64  }
   0x8   : > { %p465_p4 = scmp.lt.s32.totalorder (!%p414_p2), %s2626_s30, 1 }
   0xb   : > { %v2161_v0 = vld [vmem:[%s3415_s1 + $0x1c0] sm:$0xff]  ;;  %v2541_v3 = vmov 0   ;;  %vm523_vm0 = vcmask 1045504   ;;  %s3430_s21 = smov (!%p460_p3, %s2085_s21), 15  ;;  %v2162_v8 = vld [vmem:[%s3415_s1 + $0x1c8] sm:$0xff]  ;;  %vm510_vm1 = vcmask 97280  }
   0xc   : > { %v2153_v1 = vld [vmem:[%s3415_s1 + $0x180] sm:$0xff]  ;;  %2376 = vset.pattern.permute.xlu2 %v2541_v3  ;;  %2375 = vset.pattern.permute.xlu1 %v2541_v3  ;;  %s2086_s28 = sshll.u32 %s3430_s21, 2  ;;  %v2154_v9 = vld [vmem:[%s3415_s1 + $0x188] sm:$0xff]  ;;  %v2155_v19 = vld [vmem:[%s3415_s1 + $0x190] sm:$0xff]  ;;  %vm713_vm2 = vcmask 1046528   ;;  %vm566_vm3 = vcmask 1040384  }
   0xd   : > { %v2145_v2 = vld [vmem:[%s3415_s1 + $0x140] sm:$0xff]  ;;  %2374 = vset.pattern.permute.xlu0 %v2541_v3  ;;  %1033 = vperm.xlu2 %2376, %v2161_v0   ;;  %s2652_s17 = scalar_lea.vmem %s3414_s0, %s2086_s28  ;;  %v2146_v11 = vld [vmem:[%s3415_s1 + $0x148] sm:$0xff]  ;;  %v2148_v20 = vld [vmem:[%s3415_s1 + $0x158] sm:$0xff]  ;;  %vm1328_vm4 = vcmask 261120   ;;  %vm1337_vm5 = vcmask 523264   ;;  %vm1346_vm6 = vcmask 785408  }
   0xe   : > { %v2107_v4 = vld [vmem:[%s3416_s2] sm:$0xf]  ;;  %v2327_v5 = vld [vmem:[%s3416_s2] sm:$0x30]  ;;  %976 = vperm.xlu1 %2375, %v2153_v1   ;;  %919 = vperm.xlu0 %2374, %v2145_v2   ;;  %v2114_v13 = vld [vmem:[%s3415_s1 + $0x48] sm:$0xff]  ;;  %vm1783_vm7 = vcmask 1043456  }
   0xf   : > { %v2108_v6 = vor.u32 %v2327_v5, %v2107_v4  ;;  %v2323_v10 = vld [vmem:[%s2652_s17] sm:$0xff]  ;;  %v2324_v15 = vld [vmem:[%s2652_s17 + $0x8] sm:$0xff]  ;;  %v2147_v21 = vld [vmem:[%s3415_s1 + $0x150] sm:$0xff]  ;;  %s3432_s30 = smov (!%p465_p4, %s2626_s30), 1 }
  0x10   : > { %v2121_v12 = vld [vmem:[%s3415_s1 + $0x80] sm:$0xff]  ;;  %v2130_v16 = vld [vmem:[%s3415_s1 + $0xc8] sm:$0xff]  ;;  %v2325_v22 = vld [vmem:[%s2652_s17 + $0x10] sm:$0xff] }
  0x11   : > { %v525_v7 = vsel %vm523_vm0, %v2108_v6, 0  ;;  %v2113_v14 = vld [vmem:[%s3415_s1 + $0x40] sm:$0xff]  ;;  %v2122_v18 = vld [vmem:[%s3415_s1 + $0x88] sm:$0xff]  ;;  %v2164_v23 = vld [vmem:[%s3415_s1 + $0x1d8] sm:$0xff] }
  0x12   : > { %534 = vmatpush.bf16.msra.mxu0 %v525_v7  ;;  %v2129_v17 = vld [vmem:[%s3415_s1 + $0xc0] sm:$0xff]  ;;  %v2163_v24 = vld [vmem:[%s3415_s1 + $0x1d0] sm:$0xff]  ;;  %v2156_v25 = vld [vmem:[%s3415_s1 + $0x198] sm:$0xff] }
  0x13   : > { %v2123_v26 = vld [vmem:[%s3415_s1 + $0x90] sm:$0xff]  ;;  %v2116_v27 = vld [vmem:[%s3415_s1 + $0x58] sm:$0xff]  ;;  %v2157_v33 = vld [vmem:[%s3415_s1 + $0x1a0] sm:$0xff] }
  0x14   : > { %v2115_v28 = vld [vmem:[%s3415_s1 + $0x50] sm:$0xff]  ;;  %v2326_v29 = vld [vmem:[%s2652_s17 + $0x18] sm:$0xff]  ;;  %v2150_v34 = vld [vmem:[%s3415_s1 + $0x168] sm:$0xff]  ;;  %s2322_s17 = sshll.u32 %s3432_s30, 3 }
  0x15   : > { %2109 = vmatmul.msk.bf16.vlgmr.msra.gmra.mxu0 %vm510_vm1, %v2323_v10  ;;  %1038 = vperm.xlu2 %2376, %v2162_v8   ;;  %v2132_v30 = vld [vmem:[%s3415_s1 + $0xd8] sm:$0xff]  ;;  %v2131_v31 = vld [vmem:[%s3415_s1 + $0xd0] sm:$0xff]  ;;  %v2149_v35 = vld [vmem:[%s3415_s1 + $0x160] sm:$0xff]  ;;  %s469_s25 = scalar_lea.vmem %s3428_s14, %s2322_s17 }
  0x16   : > { %981 = vperm.xlu1 %2375, %v2154_v9   ;;  %924 = vperm.xlu0 %2374, %v2146_v11   ;;  %v2124_v32 = vld [vmem:[%s3415_s1 + $0x98] sm:$0xff]  ;;  %v2166_v36 = vld [vmem:[%s3415_s1 + $0x1e8] sm:$0xff]  ;;  %v2165_v37 = vld [vmem:[%s3415_s1 + $0x1e0] sm:$0xff] }
  0x17   : > { %v2158_v38 = vld [vmem:[%s3415_s1 + $0x1a8] sm:$0xff]  ;;  %v2125_v39 = vld [vmem:[%s3415_s1 + $0xa0] sm:$0xff]  ;;  %v2151_v51 = vld [vmem:[%s3415_s1 + $0x170] sm:$0xff] }
  0x18   : > { %v2118_v40 = vld [vmem:[%s3415_s1 + $0x68] sm:$0xff]  ;;  %v2117_v41 = vld [vmem:[%s3415_s1 + $0x60] sm:$0xff]  ;;  %v2159_v54 = vld [vmem:[%s3415_s1 + $0x1b0] sm:$0xff] }
  0x19   : > { %v2134_v42 = vld [vmem:[%s3415_s1 + $0xe8] sm:$0xff]  ;;  %v2133_v43 = vld [vmem:[%s3415_s1 + $0xe0] sm:$0xff]  ;;  %v2160_v55 = vld [vmem:[%s3415_s1 + $0x1b8] sm:$0xff] }
  0x1a   : > { %v2126_v44 = vld [vmem:[%s3415_s1 + $0xa8] sm:$0xff]  ;;  %v2137_v48 = vld [vmem:[%s3415_s1 + $0x100] sm:$0xff]  ;;  %v2168_v60 = vld [vmem:[%s3415_s1 + $0x1f8] sm:$0xff] }
  0x1b   : > { %v599_v46 = vld [vmem:[%s3415_s1 + $0x8] sm:$0xff]  ;;  %v598_v52 = vld [vmem:[%s3415_s1] sm:$0xff]  ;;  %v2119_v61 = vld [vmem:[%s3415_s1 + $0x70] sm:$0xff] }
  0x1c   : > { %v2138_v47 = vld [vmem:[%s3415_s1 + $0x108] sm:$0xff]  ;;  %v2169_v56 = vld [vmem:[%s3415_s1 + $0x200] sm:$0xff]  ;;  %v2152_v62 = vld [vmem:[%s3415_s1 + $0x178] sm:$0xff] }
  0x1d   : > { %748 = vperm.xlu2 %2376, %v2121_v12   ;;  %v2170_v50 = vld [vmem:[%s3415_s1 + $0x208] sm:$0xff]  ;;  %v2127_v2 = vld [vmem:[%s3415_s1 + $0xb0] sm:$0xff]  ;;  %v2128_v3 = vld [vmem:[%s3415_s1 + $0xb8] sm:$0xff] }
  0x1e   : > { %670 = vperm.xlu1 %2375, %v2114_v13   ;;  %665 = vperm.xlu0 %2374, %v2113_v14   ;;  %v2167_v4 = vld [vmem:[%s3415_s1 + $0x1f0] sm:$0xff]  ;;  %v2136_v9 = vld [vmem:[%s3415_s1 + $0xf8] sm:$0xff]  ;;  %v2837_v13 = vld [vmem:[%s3417_s3] ss:$0 sm:$0xff] }
  0x1f   : > { %v2139_v10 = vld [vmem:[%s3415_s1 + $0x110] sm:$0xff]  ;;  %v2120_v11 = vld [vmem:[%s3415_s1 + $0x78] sm:$0xff] }
  0x25   : > { %2110 = vmatmul.msk.bf16.gmra.mxu0 %vm510_vm1, %v2324_v15  ;;  %810 = vperm.xlu2 %2376, %v2130_v16  }
  0x26   : > { %805 = vperm.xlu1 %2375, %v2129_v17   ;;  %753 = vperm.xlu0 %2374, %v2122_v18   ;;  %v601_v18 = vld [vmem:[%s3415_s1 + $0x18] sm:$0xff] }
  0x2d   : > { %986 = vperm.xlu2 %2376, %v2155_v19   ;;  %v2135_v19 = vld [vmem:[%s3415_s1 + $0xf0] sm:$0xff] }
  0x2e   : > { %934 = vperm.xlu1 %2375, %v2148_v20   ;;  %929 = vperm.xlu0 %2374, %v2147_v21  }
  0x35   : > { %2111 = vmatmul.msk.bf16.gmra.mxu0 %vm510_vm1, %v2325_v22  ;;  %1048 = vperm.xlu2 %2376, %v2164_v23  }
  0x36   : > { %1043 = vperm.xlu1 %2375, %v2163_v24   ;;  %991 = vperm.xlu0 %2374, %v2156_v25  }
  0x3d   : > { %758 = vperm.xlu2 %2376, %v2123_v26  }
  0x3e   : > { %680 = vperm.xlu1 %2375, %v2116_v27   ;;  %675 = vperm.xlu0 %2374, %v2115_v28   ;;  %v2172_v28 = vld [vmem:[%s3415_s1 + $0x218] sm:$0xff] }
  0x45   : > { %2112 = vmatmul.msk.bf16.gmra.mxu0 %vm510_vm1, %v2326_v29  ;;  %820 = vperm.xlu2 %2376, %v2132_v30   ;;  %v2140_v30 = vld [vmem:[%s3415_s1 + $0x118] sm:$0xff] }
  0x46   : > { %815 = vperm.xlu1 %2375, %v2131_v31   ;;  %763 = vperm.xlu0 %2374, %v2124_v32  }
  0x4d   : > { %996 = vperm.xlu2 %2376, %v2157_v33  }
  0x4e   : > { %944 = vperm.xlu1 %2375, %v2150_v34   ;;  %939 = vperm.xlu0 %2374, %v2149_v35  }
  0x55   : > { %1058 = vperm.xlu2 %2376, %v2166_v36  }
  0x56   : > { %1053 = vperm.xlu1 %2375, %v2165_v37   ;;  %1001 = vperm.xlu0 %2374, %v2158_v38  }
  0x5d   : > { %768 = vperm.xlu2 %2376, %v2125_v39  }
  0x5e   : > { %690 = vperm.xlu1 %2375, %v2118_v40   ;;  %685 = vperm.xlu0 %2374, %v2117_v41  }
  0x65   : > { %830 = vperm.xlu2 %2376, %v2134_v42  }
  0x66   : > { %825 = vperm.xlu1 %2375, %v2133_v43   ;;  %773 = vperm.xlu0 %2374, %v2126_v44  }
  0x67   : > { %v2758_v45 = vpop.permute.xlu2 %1033 }
  0x6d   : > { %613 = vperm.xlu2 %2376, %v599_v46   ;;  %v600_v46 = vld [vmem:[%s3415_s1 + $0x10] sm:$0xff] }
  0x6e   : > { %867 = vperm.xlu1 %2375, %v2138_v47   ;;  %862 = vperm.xlu0 %2374, %v2137_v48  }
  0x6f   : > { %v2769_v49 = vpop.permute.xlu2 %1038 }
  0x75   : > { %1095 = vperm.xlu2 %2376, %v2170_v50  }
  0x76   : > { %949 = vperm.xlu0 %2374, %v2151_v51   ;;  %608 = vperm.xlu1 %2375, %v598_v52  }
  0x77   : > { %v2780_v53 = vpop.permute.xlu2 %748 }
  0x7d   : > { %1006 = vperm.xlu2 %2376, %v2159_v54  }
  0x7e   : > { %1011 = vperm.xlu0 %2374, %v2160_v55   ;;  %1090 = vperm.xlu1 %2375, %v2169_v56  }
  0x7f   : > { %v2791_v57 = vpop.permute.xlu2 %810 }
  0x80   : > { %v2793_v58 = vpop.permute.xlu1 %976  ;;  %v920_v59 = vpop.permute.xlu0 %919 }
  0x85   : > { %1068 = vperm.xlu2 %2376, %v2168_v60  }
  0x86   : > { %695 = vperm.xlu0 %2374, %v2119_v61   ;;  %954 = vperm.xlu1 %2375, %v2152_v62  }
  0x87   : > { %v2804_v63 = vpop.permute.xlu2 %986 }
  0x88   : > { %v2806_v0 = vpop.permute.xlu1 %981  ;;  %v925_v1 = vpop.permute.xlu0 %924 }
  0x8d   : > { %778 = vperm.xlu2 %2376, %v2127_v2  }
  0x8e   : > { %783 = vperm.xlu0 %2374, %v2128_v3   ;;  %1063 = vperm.xlu1 %2375, %v2167_v4  }
  0x8f   : > { %v2817_v5 = vpop.permute.xlu2 %1048 }
  0x90   : > { %v2819_v6 = vpop.permute.xlu1 %670  ;;  %v2821_v7 = vpop.permute.xlu0 %665 }
  0x92   : > { %v536_v8 = vpop.f32.mrf.mxu0 }
  0x93   : > { %v537_v20 = vadd.f32 %v2837_v13, %v536_v8 }
  0x95   : > { %840 = vperm.xlu2 %2376, %v2136_v9   ;;  %v2859_v26 = vmax.f32 %v537_v20, 0.0 }
  0x96   : > { %872 = vperm.xlu0 %2374, %v2139_v10   ;;  %700 = vperm.xlu1 %2375, %v2120_v11  }
  0x97   : > { %v2832_v12 = vpop.permute.xlu2 %758  ;;  %v714_v32 = vrot.slane %v2859_v26, 1  ;;  %v578_v2 = vrot.slane %v2859_v26, 7 }
  0x98   : > { %v2839_v14 = vpop.permute.xlu1 %805  ;;  %v2841_v15 = vpop.permute.xlu0 %753 }
  0x9a   : > { %v538_v16 = vpop.f32.mrf.mxu0 }
  0x9b   : > { %v539_v17 = vadd.f32 %v2837_v13, %v538_v16 }
  0x9d   : > { %623 = vperm.xlu2 %2376, %v601_v18   ;;  %v2851_v21 = vmax.f32 %v539_v17, 0.0 }
  0x9e   : > { %835 = vperm.xlu1 %2375, %v2135_v19  }
  0x9f   : > { %v2853_v22 = vpop.permute.xlu2 %820  ;;  %v715_v29 = vrot.slane %v2851_v21, 1  ;;  %v1071_v33 = vmul.f32 %v2758_v45, %v2851_v21 }
  0xa0   : > { %v2855_v23 = vpop.permute.xlu1 %934  ;;  %v2857_v24 = vpop.permute.xlu0 %929 }
  0xa1   : > { %v2879_v35 = vsel %vm713_vm2, %v714_v32, %v715_v29 }
  0xa2   : > { %v541_v25 = vpop.f32.mrf.mxu0  ;;  %v957_v43 = vmul.f32 %v920_v59, %v2879_v35  ;;  %v579_v59 = vrot.slane %v2851_v21, 7 }
  0xa3   : > { %v542_v27 = vadd.f32 %v2837_v13, %v541_v25 }
  0xa4   : > { %v2923_v9 = vsel %vm566_vm3, %v578_v2, %v579_v59 }
  0xa5   : > { %v2869_v31 = vmax.f32 %v542_v27, 0.0  ;;  %1105 = vperm.xlu2 %2376, %v2172_v28   ;;  %v1014_v25 = vmul.f32 %v2793_v58, %v2923_v9 }
  0xa6   : > { %877 = vperm.xlu1 %2375, %v2140_v30  }
  0xa7   : > { %v1072_v34 = vmul.f32 %v2769_v49, %v2869_v31  ;;  %v717_v36 = vrot.slane %v2869_v31, 1  ;;  %v2882_v37 = vpop.permute.xlu2 %996  ;;  %v581_v52 = vrot.slane %v2869_v31, 7 }
  0xa8   : > { %v2884_v38 = vpop.permute.xlu1 %1043  ;;  %v2886_v39 = vpop.permute.xlu0 %991 }
  0xa9   : > { %v2377_v40 = vpack.i.bf16 %v1072_v34, %v1071_v33  ;;  %v2889_v41 = vsel %vm713_vm2, %v715_v29, %v717_v36  ;;  %v2917_v8 = vsel %vm566_vm3, %v579_v59, %v581_v52 }
  0xaa   : > { %v543_v42 = vpop.f32.mrf.mxu0  ;;  %v958_v44 = vmul.f32 %v925_v1, %v2889_v41  ;;  %v2171_v1 = vld [vmem:[%s3415_s1 + $0x210] sm:$0xff]  ;;  %v1015_v16 = vmul.f32 %v2806_v0, %v2917_v8  ;;  %v788_v29 = vmul.f32 %v2832_v12, %v2889_v41 }
  0xab   : > { %v544_v45 = vadd.f32 %v2837_v13, %v543_v42  ;;  %2378 = vrot.lane.b32.xlu0 %v2377_v40, %s2542_s19 }
  0xac   : > { %v2387_v47 = vpack.i.bf16 %v958_v44, %v957_v43 }
  0xad   : > { %v2899_v48 = vmax.f32 %v544_v45, 0.0 }
  0xae   : > { %2388 = vrot.lane.b32.xlu2 %v2387_v47, %s2543_s22  ;;  %618 = vperm.xlu1 %2375, %v600_v46  }
  0xaf   : > { %v2901_v49 = vpop.permute.xlu2 %1058  ;;  %v583_v61 = vrot.slane %v2899_v48, 7  ;;  %v719_v4 = vrot.slane %v2899_v48, 1 }
  0xb0   : > { %v681_v50 = vpop.permute.xlu1 %680  ;;  %v676_v51 = vpop.permute.xlu0 %675 }
  0xb1   : > { %v706_v54 = vmul.f32 %v681_v50, %v2869_v31  ;;  %v705_v55 = vmul.f32 %v676_v51, %v2851_v21  ;;  %v2926_v10 = vsel %vm566_vm3, %v581_v52, %v583_v61  ;;  %v2934_v20 = vsel %vm713_vm2, %v717_v36, %v719_v4 }
  0xb2   : > { %v546_v56 = vpop.f32.mrf.mxu0  ;;  %v846_v28 = vmul.f32 %v2853_v22, %v2926_v10  ;;  %v2392_v36 = vpack.i.bf16 %v1015_v16, %v1014_v25  ;;  %v959_v47 = vmul.f32 %v2857_v24, %v2934_v20  ;;  %v1073_v51 = vmul.f32 %v2884_v38, %v2899_v48 }
  0xb3   : > { %v547_v60 = vadd.f32 %v2837_v13, %v546_v56  ;;  %v2382_v62 = vpack.i.bf16 %v706_v54, %v705_v55 }
  0xb5   : > { %v2913_v3 = vmax.f32 %v547_v60, 0.0  ;;  %2383 = vrot.lane.b32.xlu0 %v2382_v62, %s2543_s22 }
  0xb6   : > { %1100 = vperm.xlu1 %2375, %v2171_v1  }
  0xb7   : > { %v2928_v11 = vpop.permute.xlu2 %768  ;;  %v721_v17 = vrot.slane %v2913_v3, 1  ;;  %v1074_v43 = vmul.f32 %v2817_v5, %v2913_v3  ;;  %v585_v44 = vrot.slane %v2913_v3, 7  ;;  %v2142_v5 = vld [vmem:[%s3415_s1 + $0x128] sm:$0xff] }
  0xb8   : > { %v816_v18 = vpop.permute.xlu1 %815  ;;  %v764_v19 = vpop.permute.xlu0 %763 }
  0xb9   : > { %v845_v27 = vmul.f32 %v816_v18, %v2917_v8  ;;  %v789_v0 = vmul.f32 %v764_v19, %v2934_v20  ;;  %v2946_v42 = vsel %vm713_vm2, %v719_v4, %v721_v17  ;;  %v2407_v55 = vpack.i.bf16 %v1074_v43, %v1073_v51 }
  0xba   : > { %v548_v30 = vpop.f32.mrf.mxu0  ;;  %v960_v12 = vmul.f32 %v2855_v23, %v2946_v42  ;;  %v2974_v24 = vsel %vm566_vm3, %v583_v61, %v585_v44 }
  0xbb   : > { %v549_v33 = vadd.f32 %v2837_v13, %v548_v30  ;;  %v2402_v34 = vpack.i.bf16 %v846_v28, %v845_v27  ;;  %v2397_v40 = vpack.i.bf16 %v789_v0, %v788_v29  ;;  %v1017_v62 = vmul.f32 %v2886_v39, %v2974_v24  ;;  %v602_v39 = vld [vmem:[%s3415_s1 + $0x20] sm:$0xff]  ;;  %v2345_v0 = vld [vmem:[%s3418_s4 + $0x88] sm:$0xff] }
  0xbc   : > { %v2412_v54 = vpack.i.bf16 %v960_v12, %v959_v47  ;;  %1615 = vmatpush.bf16.msra.mxu3 %v2345_v0  ;;  %v603_v47 = vld [vmem:[%s3415_s1 + $0x28] sm:$0xff] }
  0xbd   : > { %2403 = vrot.lane.b32.xlu2 %v2402_v34, %s2542_s19  ;;  %2393 = vrot.lane.b32.xlu0 %v2392_v36, %s2544_s24  ;;  %v2950_v58 = vmax.f32 %v549_v33, 0.0  ;;  %v704_v33 = vmul.f32 %v2819_v6, %v2859_v26 }
  0xbe   : > { %2398 = vrot.lane.b32.xlu1 %v2397_v40, %s2544_s24 }
  0xbf   : > { %v2955_v22 = vpop.permute.xlu2 %830  ;;  %v723_v52 = vrot.slane %v2950_v58, 1 }
  0xc0   : > { %v945_v45 = vpop.permute.xlu1 %944  ;;  %v940_v46 = vpop.permute.xlu0 %939 }
  0xc1   : > { %v2979_v38 = vsel %vm713_vm2, %v721_v17, %v723_v52  ;;  %v1016_v17 = vmul.f32 %v2804_v63, %v2926_v10 }
  0xc2   : > { %v551_v50 = vpop.f32.mrf.mxu0  ;;  %v961_v16 = vmul.f32 %v940_v46, %v2979_v38 }
  0xc3   : > { %v552_v23 = vadd.f32 %v2837_v13, %v551_v50  ;;  %v2417_v27 = vpack.i.bf16 %v1017_v62, %v1016_v17 }
  0xc5   : > { %v2969_v56 = vmax.f32 %v552_v23, 0.0  ;;  %2413 = vrot.lane.b32.xlu2 %v2412_v54, %s2543_s22  ;;  %2408 = vrot.lane.b32.xlu0 %v2407_v55, %s2542_s19 }
  0xc6   : > { %887 = vperm.xlu1 %2375, %v2142_v5   ;;  %v587_v5 = vrot.slane %v2950_v58, 7 }
  0xc7   : > { %v725_v59 = vrot.slane %v2969_v56, 1  ;;  %v614_v60 = vpop.permute.xlu2 %613  ;;  %v567_v23 = vrot.slane %v2969_v56, 7 }
  0xc8   : > { %v2984_v1 = vpop.permute.xlu1 %1053  ;;  %v1002_v4 = vpop.permute.xlu0 %1001 }
  0xc9   : > { %v2989_v61 = vsel %vm713_vm2, %v723_v52, %v725_v59 }
  0xca   : > { %v553_v18 = vpop.f32.mrf.mxu0  ;;  %v962_v19 = vmul.f32 %v945_v45, %v2989_v61  ;;  %v787_v45 = vmul.f32 %v2841_v15, %v2879_v35  ;;  %v844_v15 = vmul.f32 %v2791_v57, %v2923_v9  ;;  %v3055_v57 = vsel %vm566_vm3, %v587_v5, %v567_v23 }
  0xcb   : > { %v554_v25 = vadd.f32 %v2837_v13, %v553_v18  ;;  %v1019_v62 = vmul.f32 %v1002_v4, %v3055_v57 }
  0xcc   : > { %v2422_v28 = vpack.i.bf16 %v962_v19, %v961_v16 }
  0xcd   : > { %v2999_v29 = vmax.f32 %v554_v25, 0.0  ;;  %2418 = vrot.lane.b32.xlu0 %v2417_v27, %s2544_s24  ;;  %v790_v27 = vmul.f32 %v2928_v11, %v2946_v42 }
  0xce   : > { %2423 = vrot.lane.b32.xlu2 %v2422_v28, %s2543_s22  ;;  %628 = vperm.xlu1 %2375, %v602_v39   ;;  %v1075_v28 = vmul.f32 %v2984_v1, %v2950_v58  ;;  %v2144_v1 = vld [vmem:[%s3415_s1 + $0x138] sm:$0xff] }
  0xcf   : > { %v711_v63 = vrot.slane %v2999_v29, 1  ;;  %v568_v13 = vrot.slane %v2999_v29, 7  ;;  %v703_v30 = vmul.f32 %v2821_v7, %v2999_v29  ;;  %v3012_v34 = vpop.permute.xlu2 %1095  ;;  %v2344_v7 = vld [vmem:[%s3418_s4 + $0x80] sm:$0xff] }
  0xd0   : > { %v691_v40 = vpop.permute.xlu1 %690  ;;  %v686_v36 = vpop.permute.xlu0 %685  ;;  %1616 = vmatpush.bf16.msra.mxu3 %v2344_v7  ;;  %v1076_v7 = vmul.f32 %v2901_v49, %v2969_v56 }
  0xd1   : > { %v3019_v12 = vsel %vm713_vm2, %v711_v63, %v714_v32  ;;  %v2427_v43 = vpack.i.bf16 %v704_v33, %v703_v30  ;;  %v3031_v46 = vsel %vm566_vm3, %v568_v13, %v578_v2  ;;  %v2141_v32 = vld [vmem:[%s3415_s1 + $0x120] sm:$0xff]  ;;  %v3085_v30 = vsel %vm566_vm3, %v567_v23, %v568_v13 }
  0xd2   : > { %v786_v6 = vmul.f32 %v2780_v53, %v3019_v12  ;;  %v3040_v50 = vmul.f32 %v614_v60, %v3031_v46  ;;  %v843_v53 = vmul.f32 %v2839_v14, %v3031_v46  ;;  %v2173_v14 = vld [vmem:[%s3415_s1 + $0x220] sm:$0xff]  ;;  %v3062_v60 = vsel %vm566_vm3, %v585_v44, %v587_v5  ;;  %v2174_v44 = vld [vmem:[%s3415_s1 + $0x228] sm:$0xff]  ;;  %v2342_v5 = vld [vmem:[%s3418_s4 + $0x70] sm:$0xff] }
  0xd3   : > { %v1018_v25 = vmul.f32 %v2882_v37, %v3062_v60  ;;  %v708_v13 = vmul.f32 %v691_v40, %v2913_v3  ;;  %v2343_v40 = vld [vmem:[%s3418_s4 + $0x78] sm:$0xff] }
  0xd4   : > { %v2442_v2 = vpack.i.bf16 %v787_v45, %v786_v6  ;;  %v2447_v51 = vpack.i.bf16 %v844_v15, %v843_v53  ;;  %v2437_v45 = vpack.i.bf16 %v1076_v7, %v1075_v28  ;;  %v1129_v53 = vmul.f32 %v3012_v34, %v2934_v20  ;;  %1580 = vmatpush.bf16.msra.mxu2 %v2343_v40 }
  0xd5   : > { %882 = vperm.xlu0 %2374, %v2141_v32   ;;  %v2432_v39 = vpack.i.bf16 %v1019_v62, %v1018_v25 }
  0xd6   : > { %633 = vperm.xlu2 %2376, %v603_v47   ;;  %2443 = vrot.lane.b32.xlu1 %v2442_v2, %s2544_s24 }
  0xd7   : > { %v3047_v52 = vpop.permute.xlu2 %1006 }
  0xd8   : > { %v826_v54 = vpop.permute.xlu1 %825  ;;  %v774_v55 = vpop.permute.xlu0 %773  ;;  %1581 = vmatpush.bf16.msra.mxu2 %v2342_v5 }
  0xd9   : > { %v791_v18 = vmul.f32 %v774_v55, %v2979_v38  ;;  %v847_v0 = vmul.f32 %v826_v54, %v2974_v24  ;;  %v604_v54 = vld [vmem:[%s3415_s1 + $0x30] sm:$0xff] }
  0xdb   : > { %v2457_v4 = vpack.i.bf16 %v791_v18, %v790_v27 }
  0xdd   : > { %2428 = vrot.lane.b32.xlu0 %v2427_v43, %s2543_s22  ;;  %v848_v43 = vmul.f32 %v2955_v22, %v3062_v60  ;;  %v707_v22 = vmul.f32 %v686_v36, %v2899_v48 }
  0xde   : > { %2448 = vrot.lane.b32.xlu2 %v2447_v51, %s2542_s19  ;;  %1110 = vperm.xlu1 %2375, %v2173_v14   ;;  %v2143_v14 = vld [vmem:[%s3415_s1 + $0x130] sm:$0xff] }
  0xdf   : > { %v3065_v16 = vpop.permute.xlu2 %1068  ;;  %v2462_v32 = vpack.i.bf16 %v848_v43, %v847_v0  ;;  %v2452_v51 = vpack.i.bf16 %v708_v13, %v707_v22  ;;  %v2340_v0 = vld [vmem:[%s3418_s4 + $0x60] sm:$0xff]  ;;  %v2339_v43 = vld [vmem:[%s3418_s4 + $0x58] sm:$0xff]  ;;  %v2337_v22 = vld [vmem:[%s3418_s4 + $0x48] sm:$0xff] }
  0xe0   : > { %v3068_v17 = vpop.permute.xlu1 %867  ;;  %v3070_v19 = vpop.permute.xlu0 %862 }
  0xe5   : > { %2433 = vrot.lane.b32.xlu0 %v2432_v39, %s2544_s24  ;;  %v1020_v39 = vmul.f32 %v3047_v52, %v3085_v30 }
  0xe6   : > { %1115 = vperm.xlu2 %2376, %v2174_v44   ;;  %2458 = vrot.lane.b32.xlu1 %v2457_v4, %s2544_s24 }
  0xe7   : > { %v779_v37 = vpop.permute.xlu2 %778 }
  0xe8   : > { %v950_v11 = vpop.permute.xlu0 %949  ;;  %v609_v33 = vpop.permute.xlu1 %608  ;;  %v792_v4 = vmul.f32 %v779_v37, %v2989_v61 }
  0xe9   : > { %v3092_v6 = vmul.f32 %v609_v33, %v3085_v30 }
  0xed   : > { %2438 = vrot.lane.b32.xlu0 %v2437_v45, %s2542_s19  ;;  %v1078_v45 = vmul.f32 %v3065_v16, %v2859_v26 }
  0xee   : > { %2463 = vrot.lane.b32.xlu2 %v2462_v32, %s2542_s19  ;;  %897 = vperm.xlu1 %2375, %v2144_v1   ;;  %v2338_v32 = vld [vmem:[%s3418_s4 + $0x50] sm:$0xff]  ;;  %v2176_v1 = vld [vmem:[%s3415_s1 + $0x238] sm:$0xff] }
  0xef   : > { %v841_v15 = vpop.permute.xlu2 %840 }
  0xf0   : > { %v1012_v47 = vpop.permute.xlu0 %1011  ;;  %v1091_v49 = vpop.permute.xlu1 %1090 }
  0xf1   : > { %v1128_v2 = vmul.f32 %v1091_v49, %v2889_v41  ;;  %v3117_v41 = vsel %vm713_vm2, %v725_v59, %v711_v63  ;;  %v2175_v59 = vld [vmem:[%s3415_s1 + $0x230] sm:$0xff]  ;;  %v2341_v63 = vld [vmem:[%s3418_s4 + $0x68] sm:$0xff]  ;;  %v1021_v25 = vmul.f32 %v1012_v47, %v3031_v46 }
  0xf2   : > { %v963_v36 = vmul.f32 %v950_v11, %v3117_v41  ;;  %1582 = vmatpush.bf16.msra.mxu2 %v2341_v63  ;;  %v605_v11 = vld [vmem:[%s3415_s1 + $0x38] sm:$0xff] }
  0xf3   : > { %v1381_v23 = vpack.c.bf16 %v1129_v53, %v1128_v2  ;;  %v2472_v33 = vpack.i.bf16 %v1021_v25, %v1020_v39  ;;  %v850_v53 = vmul.f32 %v841_v15, %v3085_v30  ;;  %v2331_v63 = vld [vmem:[%s3418_s4 + $0x18] sm:$0xff] }
  0xf5   : > { %2249 = vmatmul.msk.bf16.vlgmr.msra.gmra.mxu3 %vm1328_vm4, %v1381_v23  ;;  %2453 = vrot.lane.b32.xlu0 %v2452_v51, %s2543_s22  ;;  %v2336_v23 = vld [vmem:[%s3418_s4 + $0x40] sm:$0xff] }
  0xf6   : > { %638 = vperm.xlu1 %2375, %v604_v54   ;;  %1583 = vmatpush.bf16.msra.mxu2 %v2340_v0 }
  0xf7   : > { %v3127_v62 = vpop.permute.xlu2 %623 }
  0xf8   : > { %v696_v20 = vpop.permute.xlu0 %695  ;;  %v955_v34 = vpop.permute.xlu1 %954 }
  0xf9   : > { %v964_v55 = vmul.f32 %v955_v34, %v3019_v12  ;;  %v709_v2 = vmul.f32 %v696_v20, %v2950_v58  ;;  %v2335_v34 = vld [vmem:[%s3418_s4 + $0x38] sm:$0xff] }
  0xfa   : > { %1584 = vmatpush.bf16.msra.mxu2 %v2339_v43  ;;  %1551 = vmatpush.bf16.msra.mxu1 %v2335_v34 }
  0xfb   : > { %v2467_v18 = vpack.i.bf16 %v964_v55, %v963_v36  ;;  %v2334_v36 = vld [vmem:[%s3418_s4 + $0x30] sm:$0xff]  ;;  %v2333_v55 = vld [vmem:[%s3418_s4 + $0x28] sm:$0xff] }
  0xfd   : > { %892 = vperm.xlu0 %2374, %v2143_v14   ;;  %2468 = vrot.lane.b32.xlu2 %v2467_v18, %s2543_s22 }
  0xfe   : > { %1120 = vperm.xlu1 %2375, %v2175_v59   ;;  %1585 = vmatpush.bf16.msra.mxu2 %v2338_v32  ;;  %v2332_v59 = vld [vmem:[%s3418_s4 + $0x20] sm:$0xff] }
  0xff   : > { %v1106_v52 = vpop.permute.xlu2 %1105  ;;  %1552 = vmatpush.bf16.msra.mxu1 %v2334_v36 }
 0x100   : > { %v784_v27 = vpop.permute.xlu0 %783  ;;  %v1064_v44 = vpop.permute.xlu1 %1063 }
 0x101   : > { %v793_v28 = vmul.f32 %v784_v27, %v3117_v41  ;;  %v1077_v37 = vmul.f32 %v1064_v44, %v2999_v29  ;;  %v1131_v44 = vmul.f32 %v1106_v52, %v2979_v38  ;;  %v901_v38 = vmul.f32 %v3068_v17, %v2851_v21 }
 0x102   : > { %1586 = vmatpush.bf16.msra.mxu2 %v2337_v22 }
 0x103   : > { %v2487_v46 = vpack.i.bf16 %v793_v28, %v792_v4  ;;  %v2477_v13 = vpack.i.bf16 %v1078_v45, %v1077_v37  ;;  %1553 = vmatpush.bf16.msra.mxu1 %v2333_v55  ;;  %v2330_v28 = vld [vmem:[%s3418_s4 + $0x10] sm:$0xff] }
 0x105   : > { %2473 = vrot.lane.b32.xlu0 %v2472_v33, %s2544_s24  ;;  %643 = vperm.xlu2 %2376, %v605_v11  }
 0x106   : > { %2488 = vrot.lane.b32.xlu1 %v2487_v46, %s2544_s24  ;;  %1587 = vmatpush.bf16.msra.mxu2 %v2336_v23  ;;  %v2329_v46 = vld [vmem:[%s3418_s4 + $0x8] sm:$0xff] }
 0x107   : > { %1554 = vmatpush.bf16.msra.mxu1 %v2332_v59 }
 0x108   : > { %v701_v7 = vpop.permute.xlu1 %700  ;;  %v2389_v16 = vpop.permute.xlu2 %2388 }
 0x109   : > { %v710_v47 = vmul.f32 %v701_v7, %v2969_v56  ;;  %v873_v30 = vpop.permute.xlu0 %872  ;;  %v2391_v11 = vunpack.i.h.bf16 %v2389_v16  ;;  %v2390_v33 = vunpack.i.l.bf16 %v2389_v16 }
 0x10b   : > { %v2482_v54 = vpack.i.bf16 %v710_v47, %v709_v2  ;;  %1555 = vmatpush.bf16.msra.mxu1 %v2331_v63  ;;  %v1356_v45 = vsel %vm1328_vm4, %v901_v38, %v2391_v11 }
 0x10d   : > { %2478 = vrot.lane.b32.xlu0 %v2477_v13, %s2542_s19  ;;  %1125 = vperm.xlu2 %2376, %v2176_v1  }
 0x10f   : > { %1556 = vmatpush.bf16.msra.mxu1 %v2330_v28 }
 0x110   : > { %v836_v49 = vpop.permute.xlu1 %835 }
 0x111   : > { %v849_v51 = vmul.f32 %v836_v49, %v3055_v57 }
 0x113   : > { %v2492_v40 = vpack.i.bf16 %v850_v53, %v849_v51  ;;  %1557 = vmatpush.bf16.msra.mxu1 %v2329_v46 }
 0x115   : > { %2483 = vrot.lane.b32.xlu0 %v2482_v54, %s2543_s22  ;;  %2493 = vrot.lane.b32.xlu2 %v2492_v40, %s2542_s19  ;;  %v902_v54 = vmul.f32 %v873_v30, %v2869_v31 }
 0x117   : > { %v3177_v15 = vpop.permute.xlu2 %2403 }
 0x118   : > { %v878_v20 = vpop.permute.xlu1 %877 }
 0x119   : > { %v903_v40 = vmul.f32 %v878_v20, %v2899_v48 }
 0x11d   : > { %v2379_v5 = vpop.permute.xlu0 %2378 }
 0x11e   : > { %v2381_v1 = vunpack.i.h.bf16 %v2379_v5  ;;  %v2380_v13 = vunpack.i.l.bf16 %v2379_v5 }
 0x11f   : > { %v2414_v14 = vpop.permute.xlu2 %2413 }
 0x120   : > { %v3185_v18 = vpop.permute.xlu1 %618  ;;  %v2416_v2 = vunpack.i.h.bf16 %v2414_v14  ;;  %v2415_v51 = vunpack.i.l.bf16 %v2414_v14 }
 0x122   : > { %v1358_v59 = vsel %vm1328_vm4, %v903_v40, %v2416_v2  ;;  %v1357_v63 = vsel %vm1328_vm4, %v902_v54, %v2415_v51  ;;  %v649_v54 = vmul.f32 %v3127_v62, %v2917_v8  ;;  %v648_v40 = vmul.f32 %v3185_v18, %v2923_v9 }
 0x123   : > { %v2405_v8 = vunpack.i.l.bf16 %v3177_v15 }
 0x127   : > { %v3193_v25 = vpop.permute.xlu0 %2383 }
 0x128   : > { %v1101_v27 = vpop.permute.xlu1 %1100  ;;  %v3197_v4 = vpop.permute.xlu2 %2423  ;;  %v2385_v2 = vunpack.i.l.bf16 %v3193_v25 }
 0x129   : > { %v1130_v39 = vmul.f32 %v1101_v27, %v2946_v42  ;;  %v900_v42 = vmul.f32 %v3070_v19, %v2859_v26  ;;  %v2328_v26 = vld [vmem:[%s3418_s4] sm:$0xff] }
 0x12a   : > { %1558 = vmatpush.bf16.msra.mxu1 %v2328_v26 }
 0x12b   : > { %v1384_v0 = vpack.c.bf16 %v1131_v44, %v1130_v39  ;;  %v1355_v32 = vsel %vm1328_vm4, %v900_v42, %v2390_v33 }
 0x12d   : > { %2250 = vmatmul.msk.bf16.gmra.mxu3 %vm1328_vm4, %v1384_v0 }
 0x12f   : > { %v2394_v43 = vpop.permute.xlu0 %2393 }
 0x130   : > { %v2396_v52 = vunpack.i.h.bf16 %v2394_v43  ;;  %v2395_v37 = vunpack.i.l.bf16 %v2394_v43  ;;  %v3210_v7 = vpop.permute.xlu1 %2398  ;;  %v3221_v47 = vpop.permute.xlu2 %633 }
 0x131   : > { %v2401_v51 = vunpack.i.h.bf16 %v3210_v7 }
 0x132   : > { %v1363_v22 = vsel %vm1337_vm5, %v1355_v32, %v2395_v37  ;;  %v1364_v21 = vsel %vm1337_vm5, %v1356_v45, %v2396_v52 }
 0x133   : > { %v1371_v17 = vsel %vm1346_vm6, %v1363_v22, %v2380_v13  ;;  %v1372_v19 = vsel %vm1346_vm6, %v1364_v21, %v2381_v1 }
 0x134   : > { %v1380_v16 = vpack.c.bf16 %v1372_v19, %v1371_v17 }
 0x136   : > { %1588 = vmatmul.bf16.vlgmr.msra.gmra.mxu2 %v1380_v16 }
 0x137   : > { %v2409_v49 = vpop.permute.xlu0 %2408 }
 0x138   : > { %v888_v53 = vpop.permute.xlu1 %887  ;;  %v2449_v23 = vpop.permute.xlu2 %2448  ;;  %v2411_v27 = vunpack.i.h.bf16 %v2409_v49  ;;  %v2410_v44 = vunpack.i.l.bf16 %v2409_v49 }
 0x139   : > { %v2451_v45 = vunpack.i.h.bf16 %v2449_v23  ;;  %v2450_v32 = vunpack.i.l.bf16 %v2449_v23  ;;  %v2400_v23 = vunpack.i.l.bf16 %v3210_v7  ;;  %v2425_v7 = vunpack.i.l.bf16 %v3197_v4 }
 0x13f   : > { %v2419_v34 = vpop.permute.xlu0 %2418 }
 0x140   : > { %v2421_v36 = vunpack.i.h.bf16 %v2419_v34  ;;  %v2420_v55 = vunpack.i.l.bf16 %v2419_v34  ;;  %v3225_v5 = vpop.permute.xlu1 %628  ;;  %v1116_v20 = vpop.permute.xlu2 %1115  ;;  %v905_v34 = vmul.f32 %v888_v53, %v2950_v58 }
 0x141   : > { %v1133_v42 = vmul.f32 %v1116_v20, %v3117_v41 }
 0x142   : > { %v1365_v39 = vsel %vm1337_vm5, %v1357_v63, %v2420_v55  ;;  %v1366_v14 = vsel %vm1337_vm5, %v1358_v59, %v2421_v36 }
 0x143   : > { %v1373_v28 = vsel %vm1346_vm6, %v1365_v39, %v2410_v44  ;;  %v1374_v31 = vsel %vm1346_vm6, %v1366_v14, %v2411_v27  ;;  %v2426_v27 = vunpack.i.h.bf16 %v3197_v4  ;;  %v2406_v44 = vunpack.i.h.bf16 %v3177_v15 }
 0x144   : > { %v1383_v48 = vpack.c.bf16 %v1374_v31, %v1373_v28 }
 0x146   : > { %1593 = vmatmul.bf16.gmra.mxu2 %v1383_v48 }
 0x147   : > { %v883_v30 = vpop.permute.xlu0 %882 }
 0x148   : > { %v2444_v0 = vpop.permute.xlu1 %2443  ;;  %v3235_v1 = vpop.permute.xlu2 %2463  ;;  %v904_v36 = vmul.f32 %v883_v30, %v2913_v3  ;;  %v1360_v3 = vsel %vm1328_vm4, %v905_v34, %v2426_v27 }
 0x149   : > { %v2446_v43 = vunpack.i.h.bf16 %v2444_v0  ;;  %v2445_v52 = vunpack.i.l.bf16 %v2444_v0 }
 0x14a   : > { %v1359_v18 = vsel %vm1328_vm4, %v904_v36, %v2425_v7 }
 0x14f   : > { %v2429_v11 = vpop.permute.xlu0 %2428 }
 0x150   : > { %v2431_v33 = vunpack.i.h.bf16 %v2429_v11  ;;  %v2430_v46 = vunpack.i.l.bf16 %v2429_v11  ;;  %v1111_v38 = vpop.permute.xlu1 %1110 }
 0x151   : > { %v1132_v37 = vmul.f32 %v1111_v38, %v2989_v61 }
 0x152   : > { %v1330_v13 = vsel %vm1328_vm4, %v3040_v50, %v2431_v33  ;;  %v1329_v22 = vsel %vm1328_vm4, %v3092_v6, %v2430_v46  ;;  %v2386_v50 = vunpack.i.h.bf16 %v3193_v25  ;;  %v1331_v25 = vsel %vm1328_vm4, %v648_v40, %v2385_v2 }
 0x153   : > { %v1387_v21 = vpack.c.bf16 %v1133_v42, %v1132_v37  ;;  %v1338_v26 = vsel %vm1337_vm5, %v1329_v22, %v2445_v52  ;;  %v1339_v17 = vsel %vm1337_vm5, %v1330_v13, %v2446_v43  ;;  %v1340_v9 = vsel %vm1337_vm5, %v1331_v25, %v2400_v23 }
 0x154   : > { %v1347_v41 = vsel %vm1346_vm6, %v1338_v26, %v2450_v32  ;;  %v1348_v19 = vsel %vm1346_vm6, %v1339_v17, %v2451_v45  ;;  %v1332_v63 = vsel %vm1328_vm4, %v649_v54, %v2386_v50  ;;  %v1349_v48 = vsel %vm1346_vm6, %v1340_v9, %v2405_v8 }
 0x155   : > { %2251 = vmatmul.msk.bf16.gmra.mxu3 %vm1328_vm4, %v1387_v21  ;;  %v1379_v61 = vpack.c.bf16 %v1348_v19, %v1347_v41  ;;  %v1341_v58 = vsel %vm1337_vm5, %v1332_v63, %v2401_v51  ;;  %v651_v43 = vmul.f32 %v3221_v47, %v2974_v24  ;;  %v650_v52 = vmul.f32 %v3225_v5, %v2926_v10 }
 0x156   : > { %v1350_v30 = vsel %vm1346_vm6, %v1341_v58, %v2406_v44  ;;  %v2466_v41 = vunpack.i.h.bf16 %v3235_v1  ;;  %v2465_v19 = vunpack.i.l.bf16 %v3235_v1 }
 0x157   : > { %v2434_v16 = vpop.permute.xlu0 %2433  ;;  %1559 = vmatmul.bf16.vlgmr.msra.gmra.mxu1 %v1379_v61  ;;  %v3248_v6 = vpop.permute.xlu2 %2468  ;;  %v1382_v11 = vpack.c.bf16 %v1350_v30, %v1349_v48  ;;  %v2528_v48 = vld [vmem:[%s3419_s5] ss:$0 sm:$0xff] }
 0x158   : > { %v2459_v49 = vpop.permute.xlu1 %2458  ;;  %v2436_v55 = vunpack.i.h.bf16 %v2434_v16  ;;  %v2435_v59 = vunpack.i.l.bf16 %v2434_v16 }
 0x159   : > { %v2461_v32 = vunpack.i.h.bf16 %v2459_v49  ;;  %v2460_v13 = vunpack.i.l.bf16 %v2459_v49 }
 0x15a   : > { %v1367_v28 = vsel %vm1337_vm5, %v1359_v18, %v2435_v59  ;;  %v1368_v4 = vsel %vm1337_vm5, %v1360_v3, %v2436_v55 }
 0x15f   : > { %v2439_v62 = vpop.permute.xlu0 %2438  ;;  %v644_v0 = vpop.permute.xlu2 %643 }
 0x160   : > { %v2441_v53 = vunpack.i.h.bf16 %v2439_v62  ;;  %v2440_v39 = vunpack.i.l.bf16 %v2439_v62  ;;  %v898_v14 = vpop.permute.xlu1 %897  ;;  %v653_v44 = vmul.f32 %v644_v0, %v3055_v57 }
 0x161   : > { %v907_v2 = vmul.f32 %v898_v14, %v2999_v29 }
 0x162   : > { %v1375_v31 = vsel %vm1346_vm6, %v1367_v28, %v2440_v39  ;;  %v1376_v15 = vsel %vm1346_vm6, %v1368_v4, %v2441_v53 }
 0x163   : > { %v1386_v20 = vpack.c.bf16 %v1376_v15, %v1375_v31 }
 0x165   : > { %1598 = vmatmul.bf16.gmra.mxu2 %v1386_v20 }
 0x167   : > { %v2454_v33 = vpop.permute.xlu0 %2453  ;;  %1564 = vmatmul.bf16.gmra.mxu1 %v1382_v11  ;;  %v1126_v22 = vpop.permute.xlu2 %1125 }
 0x168   : > { %v2456_v46 = vunpack.i.h.bf16 %v2454_v33  ;;  %v2455_v38 = vunpack.i.l.bf16 %v2454_v33  ;;  %v639_v42 = vpop.permute.xlu1 %638  ;;  %v1135_v47 = vmul.f32 %v1126_v22, %v2879_v35  ;;  %v2471_v35 = vunpack.i.h.bf16 %v3248_v6 }
 0x169   : > { %v652_v8 = vmul.f32 %v639_v42, %v3062_v60 }
 0x16a   : > { %v1334_v37 = vsel %vm1328_vm4, %v651_v43, %v2456_v46  ;;  %v1333_v45 = vsel %vm1328_vm4, %v650_v52, %v2455_v38  ;;  %v1362_v40 = vsel %vm1328_vm4, %v907_v2, %v2471_v35 }
 0x16b   : > { %v1342_v26 = vsel %vm1337_vm5, %v1333_v45, %v2460_v13  ;;  %v1343_v17 = vsel %vm1337_vm5, %v1334_v37, %v2461_v32 }
 0x16c   : > { %v1351_v5 = vsel %vm1346_vm6, %v1342_v26, %v2465_v19  ;;  %v1352_v61 = vsel %vm1346_vm6, %v1343_v17, %v2466_v41 }
 0x16d   : > { %v1385_v49 = vpack.c.bf16 %v1352_v61, %v1351_v5 }
 0x16f   : > { %v893_v21 = vpop.permute.xlu0 %892  ;;  %v2494_v7 = vpop.permute.xlu2 %2493 }
 0x170   : > { %v1121_v24 = vpop.permute.xlu1 %1120  ;;  %v906_v51 = vmul.f32 %v893_v21, %v2969_v56  ;;  %v2496_v18 = vunpack.i.h.bf16 %v2494_v7  ;;  %v2495_v53 = vunpack.i.l.bf16 %v2494_v7 }
 0x171   : > { %v1134_v10 = vmul.f32 %v1121_v24, %v3019_v12  ;;  %v2470_v12 = vunpack.i.l.bf16 %v3248_v6 }
 0x173   : > { %v1390_v16 = vpack.c.bf16 %v1135_v47, %v1134_v10  ;;  %v1361_v34 = vsel %vm1328_vm4, %v906_v51, %v2470_v12 }
 0x175   : > { %2252 = vmatmul.msk.bf16.gmra.mxu3 %vm1328_vm4, %v1390_v16 }
 0x177   : > { %v2474_v50 = vpop.permute.xlu0 %2473  ;;  %1569 = vmatmul.bf16.gmra.mxu1 %v1385_v49 }
 0x178   : > { %v2476_v1 = vunpack.i.h.bf16 %v2474_v50  ;;  %v2475_v23 = vunpack.i.l.bf16 %v2474_v50  ;;  %v2489_v27 = vpop.permute.xlu1 %2488  ;;  %v1618_v30 = vpop.f32.mrf.mxu3 }
 0x179   : > { %v2491_v58 = vunpack.i.h.bf16 %v2489_v27  ;;  %v2490_v3 = vunpack.i.l.bf16 %v2489_v27 }
 0x17a   : > { %v1369_v59 = vsel %vm1337_vm5, %v1361_v34, %v2475_v23  ;;  %v1370_v25 = vsel %vm1337_vm5, %v1362_v40, %v2476_v1 }
 0x17f   : > { %v2479_v54 = vpop.permute.xlu0 %2478 }
 0x180   : > { %v2481_v36 = vunpack.i.h.bf16 %v2479_v54  ;;  %v2480_v55 = vunpack.i.l.bf16 %v2479_v54  ;;  %v1620_v42 = vpop.f32.mrf.mxu3 }
 0x182   : > { %v1377_v29 = vsel %vm1346_vm6, %v1369_v59, %v2480_v55  ;;  %v1378_v56 = vsel %vm1346_vm6, %v1370_v25, %v2481_v36 }
 0x183   : > { %v1389_v63 = vpack.c.bf16 %v1378_v56, %v1377_v29 }
 0x185   : > { %1603 = vmatmul.bf16.gmra.mxu2 %v1389_v63 }
 0x187   : > { %v2484_v6 = vpop.permute.xlu0 %2483 }
 0x188   : > { %v2486_v62 = vunpack.i.h.bf16 %v2484_v6  ;;  %v2485_v9 = vunpack.i.l.bf16 %v2484_v6 }
 0x18a   : > { %v1335_v39 = vsel %vm1328_vm4, %v652_v8, %v2485_v9  ;;  %v1336_v14 = vsel %vm1328_vm4, %v653_v44, %v2486_v62  ;;  %v2353_v44 = vld [vmem:[%s3420_s6 + $0x38] sm:$0xff]  ;;  %v2352_v62 = vld [vmem:[%s3420_s6 + $0x30] sm:$0xff] }
 0x18b   : > { %v1344_v28 = vsel %vm1337_vm5, %v1335_v39, %v2490_v3  ;;  %v1345_v4 = vsel %vm1337_vm5, %v1336_v14, %v2491_v58  ;;  %1855 = vmatpush.bf16.msrb.mxu0 %v2353_v44 }
 0x18c   : > { %v1353_v31 = vsel %vm1346_vm6, %v1344_v28, %v2495_v53  ;;  %v1354_v57 = vsel %vm1346_vm6, %v1345_v4, %v2496_v18  ;;  %v2351_v53 = vld [vmem:[%s3420_s6 + $0x28] sm:$0xff] }
 0x18d   : > { %v1388_v15 = vpack.c.bf16 %v1354_v57, %v1353_v31 }
 0x18f   : > { %1574 = vmatmul.bf16.gmra.mxu1 %v1388_v15  ;;  %1856 = vmatpush.bf16.msrb.mxu0 %v2352_v62 }
 0x193   : > { %1857 = vmatpush.bf16.msrb.mxu0 %v2351_v53 }
 0x1b0   : > { %v1623_v22 = vpop.f32.mrf.mxu3 }
 0x1b8   : > { %v1625_v5 = vpop.f32.mrf.mxu3 }
 0x1b9   : > { %v1589_v60 = vpop.f32.mrf.mxu2 }
 0x1c1   : > { %v1591_v33 = vpop.f32.mrf.mxu2 }
 0x1c9   : > { %v1594_v32 = vpop.f32.mrf.mxu2 }
 0x1d1   : > { %v1596_v24 = vpop.f32.mrf.mxu2 }
 0x1d4   : > { %v1560_v20 = vpop.f32.mrf.mxu1 }
 0x1d5   : > { %v1561_v0 = vadd.f32 %v2528_v48, %v1560_v20 }
 0x1d7   : > { %v1590_v11 = vadd.f32 %v1589_v60, %v1561_v0 }
 0x1d8   : > { %v1628_v1 = vpop.f32.mrf.mxu3 }
 0x1d9   : > { %v1619_v46 = vadd.f32 %v1618_v30, %v1590_v11 }
 0x1db   : > { %v1638_v38 = vmax.f32 %v1619_v46, 0.0 }
 0x1dc   : > { %v1562_v43 = vpop.f32.mrf.mxu1 }
 0x1dd   : > { %1646 = vst.msk [vmem:[#allocation2] sm:$0xff] %vm1328_vm4, %v1638_v38  ;;  %v1563_v52 = vadd.f32 %v2528_v48, %v1562_v43 }
 0x1df   : > { %v1592_v37 = vadd.f32 %v1591_v33, %v1563_v52 }
 0x1e0   : > { %v1630_v55 = vpop.f32.mrf.mxu3 }
 0x1e1   : > { %v1621_v45 = vadd.f32 %v1620_v42, %v1592_v37 }
 0x1e3   : > { %v1639_v13 = vmax.f32 %v1621_v45, 0.0 }
 0x1e4   : > { %v1565_v21 = vpop.f32.mrf.mxu1 }
 0x1e5   : > { %1647 = vst.msk [vmem:[#allocation2 + $0x8] sm:$0xff] %vm1328_vm4, %v1639_v13  ;;  %v1566_v26 = vadd.f32 %v2528_v48, %v1565_v21 }
 0x1e7   : > { %v1595_v17 = vadd.f32 %v1594_v32, %v1566_v26 }
 0x1e8   : > { %v1599_v50 = vpop.f32.mrf.mxu2 }
 0x1e9   : > { %v1624_v41 = vadd.f32 %v1623_v22, %v1595_v17 }
 0x1eb   : > { %v1640_v19 = vmax.f32 %v1624_v41, 0.0 }
 0x1ec   : > { %v1567_v47 = vpop.f32.mrf.mxu1 }
 0x1ed   : > { %1648 = vst.msk [vmem:[#allocation2 + $0x10] sm:$0xff] %vm1328_vm4, %v1640_v19  ;;  %v1568_v10 = vadd.f32 %v2528_v48, %v1567_v47 }
 0x1ef   : > { %v1597_v61 = vadd.f32 %v1596_v24, %v1568_v10 }
 0x1f0   : > { %v1601_v34 = vpop.f32.mrf.mxu2 }
 0x1f1   : > { %v1626_v16 = vadd.f32 %v1625_v5, %v1597_v61 }
 0x1f3   : > { %v1641_v49 = vmax.f32 %v1626_v16, 0.0 }
 0x1f4   : > { %v1570_v2 = vpop.f32.mrf.mxu1  ;;  %v1689_v28 = vld [vmem:[#allocation2 + $0x3] ss:$16 sm:$0x3]  ;;  %v1751_v4 = vld [vmem:[#allocation2 + $0x7] ss:$16 sm:$0x3] }
 0x1f5   : > { %1649 = vst.msk [vmem:[#allocation2 + $0x18] sm:$0xff] %vm1328_vm4, %v1641_v49  ;;  %v1571_v51 = vadd.f32 %v2528_v48, %v1570_v2  ;;  %v1658_v57 = vld [vmem:[#allocation2 + $0x1] ss:$16 sm:$0x3] }
 0x1f6   : > { %v1720_v11 = vld [vmem:[#allocation2 + $0x5] ss:$16 sm:$0x3] }
 0x1f7   : > { %v1600_v23 = vadd.f32 %v1599_v50, %v1571_v51 }
 0x1f8   : > { %v1633_v27 = vpop.f32.mrf.mxu3 }
 0x1f9   : > { %v1629_v35 = vadd.f32 %v1628_v1, %v1600_v23 }
 0x1fb   : > { %v1642_v12 = vmax.f32 %v1629_v35, 0.0 }
 0x1fc   : > { %v1572_v54 = vpop.f32.mrf.mxu1  ;;  %v1693_v43 = vld [vmem:[#allocation2 + $0xa] ss:$16 sm:$0x3]  ;;  %v1755_v52 = vld [vmem:[#allocation2 + $0xe] ss:$16 sm:$0x3] }
 0x1fd   : > { %1650 = vst.msk [vmem:[#allocation2 + $0x20] sm:$0xff] %vm1328_vm4, %v1642_v12  ;;  %v1573_v40 = vadd.f32 %v2528_v48, %v1572_v54  ;;  %v1697_v37 = vld [vmem:[#allocation2 + $0xb] ss:$16 sm:$0x3] }
 0x1fe   : > { %v1759_v45 = vld [vmem:[#allocation2 + $0xf] ss:$16 sm:$0x3]  ;;  %v1666_v22 = vld [vmem:[#allocation2 + $0x9] ss:$16 sm:$0x3] }
 0x1ff   : > { %v1602_v36 = vadd.f32 %v1601_v34, %v1573_v40  ;;  %v1728_v21 = vld [vmem:[#allocation2 + $0xd] ss:$16 sm:$0x3]  ;;  %v1662_v23 = vld [vmem:[#allocation2 + $0x8] ss:$16 sm:$0x3] }
 0x200   : > { %v1635_v39 = vpop.f32.mrf.mxu3  ;;  %v1724_v35 = vld [vmem:[#allocation2 + $0xc] ss:$16 sm:$0x3]  ;;  %v2350_v34 = vld [vmem:[%s3420_s6 + $0x20] sm:$0xff] }
 0x201   : > { %v1631_v59 = vadd.f32 %v1630_v55, %v1602_v36  ;;  %1858 = vmatpush.bf16.msrb.mxu0 %v2350_v34  ;;  %v2349_v36 = vld [vmem:[%s3420_s6 + $0x18] sm:$0xff]  ;;  %v2348_v55 = vld [vmem:[%s3420_s6 + $0x10] sm:$0xff] }
 0x203   : > { %v1643_v25 = vmax.f32 %v1631_v59, 0.0  ;;  %v2347_v59 = vld [vmem:[%s3420_s6 + $0x8] sm:$0xff] }
 0x205   : > { %1651 = vst.msk [vmem:[#allocation2 + $0x28] sm:$0xff] %vm1328_vm4, %v1643_v25  ;;  %1859 = vmatpush.bf16.msrb.mxu0 %v2349_v36  ;;  %v2346_v25 = vld [vmem:[%s3420_s6] sm:$0xff] }
 0x206   : > { %v2358_v36 = vld [vmem:[%s3424_s10] sm:$0xff] }
 0x208   : > { %v1604_v29 = vpop.f32.mrf.mxu2 }
 0x209   : > { %1860 = vmatpush.bf16.msrb.mxu0 %v2348_v55  ;;  %v2361_v55 = vld [vmem:[%s3426_s12 + $0x8] sm:$0xff] }
 0x20c   : > { %v1575_v56 = vpop.f32.mrf.mxu1 }
 0x20d   : > { %v1576_v63 = vadd.f32 %v2528_v48, %v1575_v56  ;;  %1861 = vmatpush.bf16.msrb.mxu0 %v2347_v59  ;;  %v2356_v56 = vld [vmem:[%s3422_s8 + $0x10] sm:$0xff] }
 0x20f   : > { %v1605_v7 = vadd.f32 %v1604_v29, %v1576_v63  ;;  %v2357_v29 = vld [vmem:[%s3422_s8 + $0x18] sm:$0xff]  ;;  %v2355_v63 = vld [vmem:[%s3422_s8 + $0x8] sm:$0xff] }
 0x210   : > { %v1606_v3 = vpop.f32.mrf.mxu2  ;;  %1915 = vmatpush.bf16.msrb.mxu3 %v2357_v29 }
 0x211   : > { %v1634_v6 = vadd.f32 %v1633_v27, %v1605_v7  ;;  %1862 = vmatpush.bf16.msrb.mxu0 %v2346_v25  ;;  %v2354_v7 = vld [vmem:[%s3422_s8] sm:$0xff] }
 0x212   : > { %v2530_v25 = vld [vmem:[%s3423_s9] ss:$0 sm:$0xff] }
 0x213   : > { %v1644_v8 = vmax.f32 %v1634_v6, 0.0 }
 0x214   : > { %v1577_v9 = vpop.f32.mrf.mxu1  ;;  %1916 = vmatpush.bf16.msrb.mxu3 %v2356_v56 }
 0x215   : > { %1652 = vst.msk [vmem:[#allocation2 + $0x30] sm:$0xff] %vm1328_vm4, %v1644_v8  ;;  %v1578_v58 = vadd.f32 %v2528_v48, %v1577_v9 }
 0x217   : > { %v1607_v18 = vadd.f32 %v1606_v3, %v1578_v58  ;;  %v1747_v3 = vld [vmem:[#allocation2 + $0x6] ss:$16 sm:$0x3] }
 0x218   : > { %1917 = vmatpush.bf16.msrb.mxu3 %v2355_v63 }
 0x219   : > { %v1636_v14 = vadd.f32 %v1635_v39, %v1607_v18  ;;  %v1685_v18 = vld [vmem:[#allocation2 + $0x2] ss:$16 sm:$0x3] }
 0x21b   : > { %v1645_v31 = vmax.f32 %v1636_v14, 0.0 }
 0x21c   : > { %v1690_v15 = vld [vmem:[#allocation2 + $0x3] ss:$16 sm:$0xc]  ;;  %v1752_v60 = vld [vmem:[#allocation2 + $0x7] ss:$16 sm:$0xc]  ;;  %1918 = vmatpush.bf16.msrb.mxu3 %v2354_v7 }
 0x21d   : > { %1653 = vst.msk [vmem:[#allocation2 + $0x38] sm:$0xff] %vm1328_vm4, %v1645_v31  ;;  %v1691_v30 = vor.u32 %v1690_v15, %v1689_v28  ;;  %v1753_v48 = vor.u32 %v1752_v60, %v1751_v4  ;;  %v1659_v20 = vld [vmem:[#allocation2 + $0x1] ss:$16 sm:$0xc] }
 0x21e   : > { %v1660_v0 = vor.u32 %v1659_v20, %v1658_v57  ;;  %v1721_v33 = vld [vmem:[#allocation2 + $0x5] ss:$16 sm:$0xc]  ;;  %v1686_v44 = vld [vmem:[#allocation2 + $0x2] ss:$16 sm:$0xc] }
 0x21f   : > { %v2497_v46 = vpack.i.bf16 %v1753_v48, %v1691_v30  ;;  %v1722_v38 = vor.u32 %v1721_v33, %v1720_v11  ;;  %v1748_v8 = vld [vmem:[#allocation2 + $0x6] ss:$16 sm:$0xc]  ;;  %v1687_v4 = vor.u32 %v1686_v44, %v1685_v18  ;;  %v1717_v31 = vld [vmem:[#allocation2 + $0x4] ss:$16 sm:$0xc] }
 0x220   : > { %v1749_v28 = vor.u32 %v1748_v8, %v1747_v3  ;;  %v1655_v48 = vld [vmem:[#allocation2] ss:$16 sm:$0xc]  ;;  %v1716_v33 = vld [vmem:[#allocation2 + $0x4] ss:$16 sm:$0x3]  ;;  %1997 = vmatpush.bf16.msra.mxu3 %v2361_v55 }
 0x221   : > { %2498 = vrot.lane.b32.xlu0 %v2497_v46, %s2543_s22  ;;  %v2502_v42 = vpack.i.bf16 %v1722_v38, %v1660_v0  ;;  %v1718_v38 = vor.u32 %v1717_v31, %v1716_v33  ;;  %v2360_v44 = vld [vmem:[%s3426_s12] sm:$0xff] }
 0x223   : > { %2503 = vrot.lane.b32.xlu2 %v2502_v42, %s2543_s22  ;;  %v1654_v42 = vld [vmem:[#allocation2] ss:$16 sm:$0x3] }
 0x224   : > { %v1694_v32 = vld [vmem:[#allocation2 + $0xa] ss:$16 sm:$0xc]  ;;  %v1756_v13 = vld [vmem:[#allocation2 + $0xe] ss:$16 sm:$0xc]  ;;  %1998 = vmatpush.bf16.msra.mxu3 %v2360_v44 }
 0x225   : > { %v1695_v26 = vor.u32 %v1694_v32, %v1693_v43  ;;  %v1757_v17 = vor.u32 %v1756_v13, %v1755_v52  ;;  %v1698_v41 = vld [vmem:[#allocation2 + $0xb] ss:$16 sm:$0xc]  ;;  %v1760_v19 = vld [vmem:[#allocation2 + $0xf] ss:$16 sm:$0xc]  ;;  %v1656_v52 = vor.u32 %v1655_v48, %v1654_v42 }
 0x226   : > { %v1699_v24 = vor.u32 %v1698_v41, %v1697_v37  ;;  %v1761_v47 = vor.u32 %v1760_v19, %v1759_v45  ;;  %v1667_v10 = vld [vmem:[#allocation2 + $0x9] ss:$16 sm:$0xc]  ;;  %v1729_v5 = vld [vmem:[#allocation2 + $0xd] ss:$16 sm:$0xc] }
 0x227   : > { %v2507_v61 = vpack.i.bf16 %v1757_v17, %v1695_v26  ;;  %v1668_v16 = vor.u32 %v1667_v10, %v1666_v22  ;;  %v1730_v49 = vor.u32 %v1729_v5, %v1728_v21  ;;  %v1663_v2 = vld [vmem:[#allocation2 + $0x8] ss:$16 sm:$0xc]  ;;  %v1725_v51 = vld [vmem:[#allocation2 + $0xc] ss:$16 sm:$0xc] }
 0x228   : > { %v2512_v50 = vpack.i.bf16 %v1761_v47, %v1699_v24  ;;  %v1664_v12 = vor.u32 %v1663_v2, %v1662_v23  ;;  %v1726_v54 = vor.u32 %v1725_v51, %v1724_v35  ;;  %v2359_v2 = vld [vmem:[%s3424_s10 + $0x8] sm:$0xff] }
 0x229   : > { %2508 = vrot.lane.b32.xlu1 %v2507_v61, %s2544_s24  ;;  %v2522_v1 = vpack.i.bf16 %v1730_v49, %v1668_v16  ;;  %1957 = vmatpush.bf16.msra.mxu0 %v2359_v2 }
 0x22a   : > { %2513 = vrot.lane.b32.xlu0 %v2512_v50, %s2542_s19  ;;  %v2517_v40 = vpack.i.bf16 %v1726_v54, %v1664_v12 }
 0x22b   : > { %2523 = vrot.lane.b32.xlu2 %v2522_v1, %s2542_s19  ;;  %v2529_v1 = vld [vmem:[%s3421_s7] ss:$0 sm:$0xff] }
 0x22d   : > { %1958 = vmatpush.bf16.msra.mxu0 %v2358_v36 }
 0x231   : > { %2518 = vrot.lane.b32.xlu1 %v2517_v40, %s2544_s24 }
 0x27d   : > { %v2504_v6 = vpop.permute.xlu2 %2503 }
 0x27e   : > { %v2506_v20 = vunpack.i.h.bf16 %v2504_v6  ;;  %v2505_v46 = vunpack.i.l.bf16 %v2504_v6 }
 0x280   : > { %v1743_v13 = vsel %vm1328_vm4, %v1718_v38, %v2506_v20  ;;  %v1681_v26 = vsel %vm1328_vm4, %v1656_v52, %v2505_v46 }
 0x285   : > { %v2524_v43 = vpop.permute.xlu2 %2523 }
 0x286   : > { %v2526_v17 = vunpack.i.h.bf16 %v2524_v43  ;;  %v2525_v41 = vunpack.i.l.bf16 %v2524_v43 }
 0x293   : > { %v2499_v27 = vpop.permute.xlu0 %2498 }
 0x294   : > { %v2501_v62 = vunpack.i.h.bf16 %v2499_v27  ;;  %v2500_v9 = vunpack.i.l.bf16 %v2499_v27 }
 0x296   : > { %v1774_v57 = vsel %vm1328_vm4, %v1749_v28, %v2501_v62  ;;  %v1712_v15 = vsel %vm1328_vm4, %v1687_v4, %v2500_v9  ;;  %v2531_v62 = vld [vmem:[%s3425_s11] ss:$0 sm:$0xff] }
 0x29b   : > { %v2509_v58 = vpop.permute.xlu1 %2508 }
 0x29c   : > { %v2511_v53 = vunpack.i.h.bf16 %v2509_v58  ;;  %v2510_v39 = vunpack.i.l.bf16 %v2509_v58  ;;  %v2514_v14 = vpop.permute.xlu0 %2513 }
 0x29d   : > { %v2516_v60 = vunpack.i.h.bf16 %v2514_v14  ;;  %v2515_v30 = vunpack.i.l.bf16 %v2514_v14  ;;  %v2532_v14 = vld [vmem:[%s3427_s13] ss:$0 sm:$0xff] }
 0x29e   : > { %v1713_v0 = vsel %vm1337_vm5, %v1712_v15, %v2510_v39  ;;  %v1775_v11 = vsel %vm1337_vm5, %v1774_v57, %v2511_v53 }
 0x29f   : > { %v1714_v37 = vsel %vm1346_vm6, %v1713_v0, %v2515_v30  ;;  %v1776_v45 = vsel %vm1346_vm6, %v1775_v11, %v2516_v60 }
 0x2a0   : > { %v1778_v19 = vrot.slane %v1714_v37, 4  ;;  %v1781_v24 = vrot.slane %v1776_v45, 4 }
 0x2a3   : > { %v2519_v32 = vpop.permute.xlu1 %2518 }
 0x2a4   : > { %v2521_v22 = vunpack.i.h.bf16 %v2519_v32  ;;  %v2520_v21 = vunpack.i.l.bf16 %v2519_v32 }
 0x2a6   : > { %v1682_v47 = vsel %vm1337_vm5, %v1681_v26, %v2520_v21  ;;  %v1744_v10 = vsel %vm1337_vm5, %v1743_v13, %v2521_v22 }
 0x2a7   : > { %v1683_v5 = vsel %vm1346_vm6, %v1682_v47, %v2525_v41  ;;  %v1745_v61 = vsel %vm1346_vm6, %v1744_v10, %v2526_v17 }
 0x2a8   : > { %v1784_v16 = vsel %vm1783_vm7, %v1683_v5, %v1778_v19  ;;  %v1785_v49 = vsel %vm1783_vm7, %v1745_v61, %v1781_v24 }
 0x2a9   : > { %v1786_v50 = vpack.c.bf16 %v1785_v49, %v1784_v16 }
 0x2ab   : > { %1863 = vmatmul.bf16.vlgmr.msrb.gmra.mxu0 %v1786_v50 }
 0x328   : > { %v1864_v51 = vpop.f32.mrf.mxu0 }
 0x329   : > { %v1865_v23 = vadd.f32 %v2529_v1, %v1864_v51 }
 0x32b   : > { %v1869_v54 = vmax.f32 %v1865_v23, 0.0 }
 0x330   : > { %v1866_v35 = vpop.f32.mrf.mxu0 }
 0x331   : > { %v1867_v12 = vadd.f32 %v2529_v1, %v1866_v35 }
 0x333   : > { %v1870_v40 = vmax.f32 %v1867_v12, 0.0 }
 0x335   : > { %v1871_v34 = vpack.c.bf16 %v1870_v40, %v1869_v54 }
 0x337   : > { %2301 = vmatmul.msk.bf16.vlgmr.msrb.gmra.mxu3 %vm1337_vm5, %v1871_v34 }
 0x3ba   : > { %v1920_v59 = vpop.f32.mrf.mxu3 }
 0x3bb   : > { %v1921_v29 = vadd.f32 %v2530_v25, %v1920_v59 }
 0x3bd   : > { %v1925_v27 = vmax.f32 %v1921_v29, 0.0 }
 0x3c2   : > { %v1922_v56 = vpop.f32.mrf.mxu3 }
 0x3c3   : > { %v1923_v63 = vadd.f32 %v2530_v25, %v1922_v56 }
 0x3c5   : > { %v1926_v7 = vmax.f32 %v1923_v63, 0.0 }
 0x3c7   : > { %v1927_v6 = vpack.c.bf16 %v1926_v7, %v1925_v27 }
 0x3c9   : > { %2310 = vmatmul.msk.bf16.vlgmr.msra.gmra.mxu0 %vm1328_vm4, %v1927_v6 }
 0x446   : > { %v1960_v8 = vpop.f32.mrf.mxu0 }
 0x447   : > { %v1961_v9 = vadd.f32 %v2531_v62, %v1960_v8 }
 0x449   : > { %v1965_v18 = vmax.f32 %v1961_v9, 0.0 }
 0x44e   : > { %v1962_v58 = vpop.f32.mrf.mxu0 }
 0x44f   : > { %v1963_v3 = vadd.f32 %v2531_v62, %v1962_v58 }
 0x451   : > { %v1966_v53 = vmax.f32 %v1963_v3, 0.0 }
 0x453   : > { %v1967_v39 = vpack.c.bf16 %v1966_v53, %v1965_v18 }
 0x455   : > { %2319 = vmatmul.msk.bf16.vlgmr.msra.gmra.mxu3 %vm1328_vm4, %v1967_v39 }
 0x4d8   : > { %v2000_v28 = vpop.f32.mrf.mxu3 }
 0x4d9   : > { %v2001_v4 = vadd.f32 %v2532_v14, %v2000_v28 }
 0x4db   : > { %v2005_v31 = vmax.f32 %v2001_v4, 0.0 }
 0x4dd   : > { %v2008_v57 = vrot.slane %v2005_v31, 4 }
 0x4df   : > { %2009 = vrot.lane.b32.xlu1 %v2008_v57, %s2544_s24 }
 0x4e0   : > { %v2002_v15 = vpop.f32.mrf.mxu3 }
 0x4e1   : > { %v2003_v60 = vadd.f32 %v2532_v14, %v2002_v15 }
 0x4e3   : > { %v2006_v30 = vmax.f32 %v2003_v60, 0.0 }
 0x4e5   : > { %v2013_v48 = vrot.slane %v2006_v30, 4 }
 0x4e7   : > { %2014 = vrot.lane.b32.xlu0 %v2013_v48, %s2544_s24 }
 0x551   : > { %v2010_v20 = vpop.permute.xlu1 %2009 }
 0x552   : > { %v2017_v46 = vsel %vm1337_vm5, %v2005_v31, %v2010_v20 }
 0x559   : > { %v2015_v0 = vpop.permute.xlu0 %2014 }
 0x55a   : > { %v2018_v11 = vsel %vm1337_vm5, %v2006_v30, %v2015_v0 }
 0x55b   : > { %v2021_v33 = vrot.slane %v2018_v11, 4 }
 0x55d   : > { %v2022_v38 = vsel %vm1783_vm7, %v2017_v46, %v2021_v33 }
 0x55e   : > { %2024 = vst [vmem:[%s469_s25] sm:$0xff] %v2022_v38 }
 0x55f PF: > { %s24_s29 = sadd.s32 1, %s2539_s29  }
 0x560   : > { %p21_p5 = scmp.ge.s32.totalorder %s24_s29, 4  }
 0x562   :  { %23 = sbr.rel (!%p21_p5) target bundleno = 1 (0x1), region = 129 }

</bundles_post_ra>
